<compile_context>
chip_gen: v7x
topology: tpu7x:2x2x1
jax: 0.10.0
libtpu: 0.0.40
codegen_flags: <defaults>
</compile_context>

<pallas_src>
import math
from functools import partial

import jax
import jax.numpy as jnp
from jax import lax
from jax.experimental import pallas as pl
from jax.experimental.pallas import tpu as pltpu


ACT_DTYPE = jnp.bfloat16          # inter-kernel activation / MXU operand dtype
VMEM_LIMIT = 32 * 1024 * 1024     # safe scoped-VMEM cap on v5e / v6e / v7x

# Max tile sizes (multiples of 8 / 128); dims <= max use the full extent.
TM_MAX = 512        # activation rows in the generic matmul
TN_MAX = 512        # output-feature tile (wider N tile -> fewer x re-streams)
TK_MAX = 512        # contraction tile
ROW_TILE_MAX = 256  # row tiles for fused FFN / LN kernels (keeps tm*d_ff small on v7x)
TQ_MAX = 256        # query-row tile in attention


def _round_up(x, m):
    return ((x + m - 1) // m) * m


def _pick_tile(dim, max_tile):
    """(tile, padded_dim): full extent for small dims, else max_tile tiling."""
    if dim <= max_tile:
        return dim, dim
    return max_tile, _round_up(dim, max_tile)


def _pad_rows(x, rows):
    return jnp.pad(x, ((0, rows - x.shape[0]), (0, 0))) if rows != x.shape[0] else x


# --------------------------------------------------------------------------
# Kernels
# --------------------------------------------------------------------------
def _ln_math(x, g, b, eps):
    mean = jnp.mean(x, axis=-1, keepdims=True)
    var = jnp.mean(jnp.square(x - mean), axis=-1, keepdims=True)
    return (x - mean) * lax.rsqrt(var + eps) * g + b


def _matmul_kernel(x_ref, w_ref, b_ref, o_ref, acc_ref):
    """x @ w + b.  Grid = (M/tm, N/tn, K/tk); K is the trailing reduction axis."""
    @pl.when(pl.program_id(2) == 0)
    def _():
        acc_ref[...] = jnp.zeros_like(acc_ref)

    acc_ref[...] += jnp.dot(x_ref[...], w_ref[...],
                            preferred_element_type=jnp.float32)

    @pl.when(pl.program_id(2) == pl.num_programs(2) - 1)
    def _():
        o_ref[...] = (acc_ref[...] + b_ref[...]).astype(o_ref.dtype)


def _attn_kernel(q_ref, k_ref, v_ref, xres_ref, wo_ref, bo_ref, g_ref, b_ref,
                 o_ref, acc_ref, *, scale, eps):
    """One (batch, q-tile, head) step of MHA with fused out-proj + add + LN.

    Heads are the innermost ("arbitrary") grid axis; att_h @ wo_h is accumulated
    into an f32 VMEM scratch, so the head concat is never materialised.  Softmax
    math is f32; matmul operands are bf16.
    """
    h = pl.program_id(2)

    @pl.when(h == 0)
    def _():
        acc_ref[...] = jnp.zeros_like(acc_ref)

    q = q_ref[0, 0]                    # (tq, Dh)  bf16
    k = k_ref[0, 0]                    # (Lk, Dh)  bf16
    v = v_ref[0, 0]                    # (Lk, Dh)  bf16

    # q/k contracted on their last dims (no in-kernel transpose).
    s = lax.dot_general(q, k, (((1,), (1,)), ((), ())),
                        preferred_element_type=jnp.float32) * scale
    s = s - jnp.max(s, axis=-1, keepdims=True)
    p = jnp.exp(s)
    p = p * pl.reciprocal(jnp.sum(p, axis=-1, keepdims=True), approx=True)

    att = jnp.dot(p.astype(v.dtype), v, preferred_element_type=jnp.float32)
    acc_ref[...] += jnp.dot(att.astype(wo_ref.dtype), wo_ref[0],
                            preferred_element_type=jnp.float32)

    @pl.when(h == pl.num_programs(2) - 1)
    def _():
        y = acc_ref[...] + bo_ref[...]
        x = xres_ref[0].astype(jnp.float32) + y
        o_ref[0] = _ln_math(x, g_ref[...], b_ref[...], eps).astype(o_ref.dtype)


def _ffn_kernel(x_ref, w1_ref, b1_ref, w2_ref, b2_ref, g_ref, b_ref, o_ref, *, eps):
    """Fused LN(x + relu(x@w1+b1)@w2+b2); the d_ff intermediate never leaves VMEM."""
    x = x_ref[...]                                                    # bf16
    h = jnp.dot(x, w1_ref[...], preferred_element_type=jnp.float32) + b1_ref[...]
    h = jnp.maximum(h, 0.0).astype(w2_ref.dtype)                      # bf16
    y = jnp.dot(h, w2_ref[...], preferred_element_type=jnp.float32) + b2_ref[...]
    xf = x.astype(jnp.float32) + y
    o_ref[...] = _ln_math(xf, g_ref[...], b_ref[...], eps).astype(o_ref.dtype)


def _ln_kernel(x_ref, g_ref, b_ref, o_ref, *, eps):
    x = x_ref[...].astype(jnp.float32)
    o_ref[...] = _ln_math(x, g_ref[...], b_ref[...], eps).astype(o_ref.dtype)


# --------------------------------------------------------------------------
# pallas_call wrappers
# --------------------------------------------------------------------------
def pallas_linear(x, w, b, out_dtype=None):
    """y = x @ w + b with bf16 operands and f32 accumulation."""
    M, K = x.shape
    N = w.shape[1]
    out_dtype = out_dtype or x.dtype
    tm, Mp = _pick_tile(M, TM_MAX)
    tn, Np = _pick_tile(N, TN_MAX)
    tk, Kp = _pick_tile(K, TK_MAX)

    # Weights / biases are pre-padded outside jit (prepare_params); these pads
    # are dead no-op fallbacks at the shapes used here.
    xp = jnp.pad(x, ((0, Mp - M), (0, Kp - K))) if (Mp, Kp) != (M, K) else x
    wp = jnp.pad(w, ((0, Kp - K), (0, Np - N))) if (Kp, Np) != (K, N) else w
    bp = jnp.pad(b, ((0, 0), (0, Np - N))) if Np != N else b

    out = pl.pallas_call(
        _matmul_kernel,
        out_shape=jax.ShapeDtypeStruct((Mp, Np), out_dtype),
        grid=(Mp // tm, Np // tn, Kp // tk),
        in_specs=[
            pl.BlockSpec((tm, tk), lambda i, j, k: (i, k)),
            pl.BlockSpec((tk, tn), lambda i, j, k: (k, j)),
            pl.BlockSpec((1, tn), lambda i, j, k: (0, j)),
        ],
        out_specs=pl.BlockSpec((tm, tn), lambda i, j, k: (i, j)),
        scratch_shapes=[pltpu.VMEM((tm, tn), jnp.float32)],
        compiler_params=pltpu.CompilerParams(
            dimension_semantics=("parallel", "parallel", "arbitrary"),
            vmem_limit_bytes=VMEM_LIMIT),
    )(xp, wp, bp)
    return out[:M, :N] if (Mp, Np) != (M, N) else out


def attention_add_ln(q, k, v, x_res, wo_h, bo, g, b, eps=1e-5):
    """Fused MHA + output projection + residual add + LayerNorm.

    q: (B,H,Lq,Dh), k/v: (B,H,Lk,Dh), x_res: (B,Lq,D), wo_h: (H,Dh,D).
    Grid = (B, Lq/tq, H): batch and query tiles are "parallel" (megacore),
    heads are the trailing "arbitrary" reduction into the VMEM accumulator.
    """
    # TODO(synk): whole-K/V per head is kept resident; add online-softmax KV
    # tiling for very long sequences.
    B, H, Lq, Dh = q.shape
    Lk = k.shape[2]
    D = H * Dh
    scale = 1.0 / math.sqrt(Dh)

    tq, Lqp = _pick_tile(Lq, TQ_MAX)
    if Lqp != Lq:   # pad query rows only (keys never padded -> softmax stays exact)
        q = jnp.pad(q, ((0, 0), (0, 0), (0, Lqp - Lq), (0, 0)))
        x_res = jnp.pad(x_res, ((0, 0), (0, Lqp - Lq), (0, 0)))

    out = pl.pallas_call(
        partial(_attn_kernel, scale=scale, eps=eps),
        out_shape=jax.ShapeDtypeStruct((B, Lqp, D), ACT_DTYPE),
        grid=(B, Lqp // tq, H),
        in_specs=[
            pl.BlockSpec((1, 1, tq, Dh), lambda bi, qi, hi: (bi, hi, qi, 0)),
            pl.BlockSpec((1, 1, Lk, Dh), lambda bi, qi, hi: (bi, hi, 0, 0)),
            pl.BlockSpec((1, 1, Lk, Dh), lambda bi, qi, hi: (bi, hi, 0, 0)),
            pl.BlockSpec((1, tq, D), lambda bi, qi, hi: (bi, qi, 0)),
            pl.BlockSpec((1, Dh, D), lambda bi, qi, hi: (hi, 0, 0)),
            pl.BlockSpec((1, D), lambda bi, qi, hi: (0, 0)),
            pl.BlockSpec((1, D), lambda bi, qi, hi: (0, 0)),
            pl.BlockSpec((1, D), lambda bi, qi, hi: (0, 0)),
        ],
        out_specs=pl.BlockSpec((1, tq, D), lambda bi, qi, hi: (bi, qi, 0)),
        scratch_shapes=[pltpu.VMEM((tq, D), jnp.float32)],
        compiler_params=pltpu.CompilerParams(
            dimension_semantics=("parallel", "parallel", "arbitrary"),
            vmem_limit_bytes=VMEM_LIMIT),
    )(q, k, v, x_res, wo_h, bo, g, b)
    return out[:, :Lq] if Lqp != Lq else out


def ffn_add_ln(x, w1, b1, w2, b2, g, b, eps=1e-5):
    """Fused LN(x + FFN(x)), row-tiled over B*L."""
    # TODO(synk): for very large d_ff on v7x, tile the reduction over d_ff
    # instead of keeping the full (tm, F) intermediate resident.
    B, L, D = x.shape
    F = w1.shape[1]
    x2 = x.reshape(-1, D)
    M = x2.shape[0]
    tm, Mp = _pick_tile(M, ROW_TILE_MAX)
    xp = _pad_rows(x2, Mp)

    out = pl.pallas_call(
        partial(_ffn_kernel, eps=eps),
        out_shape=jax.ShapeDtypeStruct((Mp, D), ACT_DTYPE),
        grid=(Mp // tm,),
        in_specs=[
            pl.BlockSpec((tm, D), lambda i: (i, 0)),
            pl.BlockSpec((D, F), lambda i: (0, 0)),
            pl.BlockSpec((1, F), lambda i: (0, 0)),
            pl.BlockSpec((F, D), lambda i: (0, 0)),
            pl.BlockSpec((1, D), lambda i: (0, 0)),
            pl.BlockSpec((1, D), lambda i: (0, 0)),
            pl.BlockSpec((1, D), lambda i: (0, 0)),
        ],
        out_specs=pl.BlockSpec((tm, D), lambda i: (i, 0)),
        compiler_params=pltpu.CompilerParams(
            dimension_semantics=("parallel",), vmem_limit_bytes=VMEM_LIMIT),
    )(xp, w1, b1, w2, b2, g, b)
    out = out[:M] if Mp != M else out
    return out.reshape(B, L, D)


def layernorm(x, g, b, eps=1e-5):
    """Standalone LN (final encoder / decoder norms)."""
    B, L, D = x.shape
    x2 = x.reshape(-1, D)
    M = x2.shape[0]
    tm, Mp = _pick_tile(M, ROW_TILE_MAX)
    xp = _pad_rows(x2, Mp)
    out = pl.pallas_call(
        partial(_ln_kernel, eps=eps),
        out_shape=jax.ShapeDtypeStruct((Mp, D), ACT_DTYPE),
        grid=(Mp // tm,),
        in_specs=[
            pl.BlockSpec((tm, D), lambda i: (i, 0)),
            pl.BlockSpec((1, D), lambda i: (0, 0)),
            pl.BlockSpec((1, D), lambda i: (0, 0)),
        ],
        out_specs=pl.BlockSpec((tm, D), lambda i: (i, 0)),
        compiler_params=pltpu.CompilerParams(
            dimension_semantics=("parallel",), vmem_limit_bytes=VMEM_LIMIT),
    )(xp, g, b)
    out = out[:M] if Mp != M else out
    return out.reshape(B, L, D)


# --------------------------------------------------------------------------
# Model pieces
# --------------------------------------------------------------------------
def embed(tokens, table, d_model):
    # TODO(synk): embedding row gather is pure data movement; done with an XLA
    # gather (jnp.take) rather than a Pallas compute kernel.
    x = jnp.take(table, tokens, axis=0) * jnp.float32(math.sqrt(d_model))
    return x.astype(ACT_DTYPE)


def _split_heads(x, nhead):
    # (B, L, D) -> (B, H, L, Dh): wrapper-side layout plumbing so the attention
    # kernel sees per-head 2D tiles (heads become a grid axis).
    B, L, D = x.shape
    return x.reshape(B, L, nhead, D // nhead).transpose(0, 2, 1, 3)


def self_attn_add_ln(x, p, g, b, nhead):
    B, L, D = x.shape
    qkv = pallas_linear(x.reshape(-1, D), p["wqkv"], p["bqkv"])
    qkv = qkv.reshape(B, L, 3, nhead, D // nhead).transpose(2, 0, 3, 1, 4)
    return attention_add_ln(qkv[0], qkv[1], qkv[2], x, p["wo_h"], p["bo"], g, b)


def cross_attn_add_ln(x, mem, p, g, b, nhead):
    B, T, D = x.shape
    S = mem.shape[1]
    q = pallas_linear(x.reshape(-1, D), p["wq"], p["bq"]).reshape(B, T, D)
    kv = pallas_linear(mem.reshape(-1, D), p["wkv"], p["bkv"])
    kv = kv.reshape(B, S, 2, nhead, D // nhead).transpose(2, 0, 3, 1, 4)
    return attention_add_ln(_split_heads(q, nhead), kv[0], kv[1], x,
                            p["wo_h"], p["bo"], g, b)


def encoder_layer(x, p, nhead):
    x = self_attn_add_ln(x, p["self_attn"], p["ln1_g"], p["ln1_b"], nhead)
    x = ffn_add_ln(x, p["w1"], p["b1"], p["w2"], p["b2"], p["ln2_g"], p["ln2_b"])
    return x


def decoder_layer(x, mem, p, nhead):
    x = self_attn_add_ln(x, p["self_attn"], p["ln1_g"], p["ln1_b"], nhead)
    x = cross_attn_add_ln(x, mem, p["cross_attn"], p["ln2_g"], p["ln2_b"], nhead)
    x = ffn_add_ln(x, p["w1"], p["b1"], p["w2"], p["b2"], p["ln3_g"], p["ln3_b"])
    return x


def transformer_forward(params, src_tokens, tgt_tokens, *, d_model, nhead, vocab_size):
    src = embed(src_tokens, params["embedding"], d_model)
    tgt = embed(tgt_tokens, params["embedding"], d_model)

    mem = src
    for lp in params["encoder_layers"]:
        mem = encoder_layer(mem, lp, nhead)
    mem = layernorm(mem, params["enc_norm_g"], params["enc_norm_b"])

    out = tgt
    for lp in params["decoder_layers"]:
        out = decoder_layer(out, mem, lp, nhead)
    out = layernorm(out, params["dec_norm_g"], params["dec_norm_b"])

    B, T, D = out.shape
    # Vocab projection writes a lane-dense (multiple of 128) padded output;
    # the slice back to vocab_size happens once, outside the kernel.
    logits = pallas_linear(out.reshape(-1, D), params["out_w"], params["out_b"],
                           out_dtype=jnp.float32)
    return logits[:, :vocab_size].reshape(B, T, vocab_size)


# --------------------------------------------------------------------------
# Parameter init (f32, PyTorch-like) + one-time kernel-ready prep (outside jit)
# --------------------------------------------------------------------------
def init_params(key, vocab, d_model, nhead, n_enc, n_dec, d_ff):
    keys = iter(jax.random.split(key, 512))

    def dense(shape, scale=0.05):
        return jax.random.normal(next(keys), shape, jnp.float32) * scale

    ones = lambda: jnp.ones((d_model,), jnp.float32)
    zeros = lambda: jnp.zeros((d_model,), jnp.float32)

    def self_attn():
        return dict(wqkv=dense((d_model, 3 * d_model)), bqkv=dense((3 * d_model,)),
                    wo=dense((d_model, d_model)), bo=dense((d_model,)))

    def cross_attn():
        return dict(wq=dense((d_model, d_model)), bq=dense((d_model,)),
                    wkv=dense((d_model, 2 * d_model)), bkv=dense((2 * d_model,)),
                    wo=dense((d_model, d_model)), bo=dense((d_model,)))

    def ffn():
        return dict(w1=dense((d_model, d_ff)), b1=dense((d_ff,)),
                    w2=dense((d_ff, d_model)), b2=dense((d_model,)))

    def enc_layer():
        d = dict(self_attn=self_attn(), ln1_g=ones(), ln1_b=zeros(),
                 ln2_g=ones(), ln2_b=zeros())
        d.update(ffn())
        return d

    def dec_layer():
        d = dict(self_attn=self_attn(), ln1_g=ones(), ln1_b=zeros(),
                 cross_attn=cross_attn(), ln2_g=ones(), ln2_b=zeros(),
                 ln3_g=ones(), ln3_b=zeros())
        d.update(ffn())
        return d

    return dict(
        embedding=dense((vocab, d_model), scale=0.1),
        encoder_layers=[enc_layer() for _ in range(n_enc)],
        decoder_layers=[dec_layer() for _ in range(n_dec)],
        enc_norm_g=ones(), enc_norm_b=zeros(),
        dec_norm_g=ones(), dec_norm_b=zeros(),
        out_w=dense((d_model, vocab)), out_b=dense((vocab,)),
    )


def prepare_params(raw, *, nhead):
    """One-time weight prep outside jit: bf16 cast, per-head wo reshape,
    (1, N) bias reshape, lane-dense padding of the vocab projection."""
    wdt = ACT_DTYPE

    def row(v):  # bias / LN vector -> (1, N) f32
        return v.reshape(1, -1).astype(jnp.float32)

    def prep_self(p):
        D = p["wo"].shape[0]
        return dict(wqkv=p["wqkv"].astype(wdt), bqkv=row(p["bqkv"]),
                    wo_h=p["wo"].reshape(nhead, D // nhead, D).astype(wdt),
                    bo=row(p["bo"]))

    def prep_cross(p):
        D = p["wo"].shape[0]
        return dict(wq=p["wq"].astype(wdt), bq=row(p["bq"]),
                    wkv=p["wkv"].astype(wdt), bkv=row(p["bkv"]),
                    wo_h=p["wo"].reshape(nhead, D // nhead, D).astype(wdt),
                    bo=row(p["bo"]))

    def prep_ffn(p):
        return dict(w1=p["w1"].astype(wdt), b1=row(p["b1"]),
                    w2=p["w2"].astype(wdt), b2=row(p["b2"]))

    def prep_enc(p):
        d = dict(self_attn=prep_self(p["self_attn"]),
                 ln1_g=row(p["ln1_g"]), ln1_b=row(p["ln1_b"]),
                 ln2_g=row(p["ln2_g"]), ln2_b=row(p["ln2_b"]))
        d.update(prep_ffn(p))
        return d

    def prep_dec(p):
        d = dict(self_attn=prep_self(p["self_attn"]),
                 cross_attn=prep_cross(p["cross_attn"]),
                 ln1_g=row(p["ln1_g"]), ln1_b=row(p["ln1_b"]),
                 ln2_g=row(p["ln2_g"]), ln2_b=row(p["ln2_b"]),
                 ln3_g=row(p["ln3_g"]), ln3_b=row(p["ln3_b"]))
        d.update(prep_ffn(p))
        return d

    vocab = raw["out_w"].shape[1]
    n_pad = _round_up(vocab, 128)
    out_w = jnp.pad(raw["out_w"], ((0, 0), (0, n_pad - vocab))).astype(wdt)
    out_b = jnp.pad(raw["out_b"], (0, n_pad - vocab)).reshape(1, n_pad).astype(jnp.float32)

    return dict(
        embedding=raw["embedding"],  # f32 table; gathered rows cast to bf16
        encoder_layers=[prep_enc(p) for p in raw["encoder_layers"]],
        decoder_layers=[prep_dec(p) for p in raw["decoder_layers"]],
        enc_norm_g=row(raw["enc_norm_g"]), enc_norm_b=row(raw["enc_norm_b"]),
        dec_norm_g=row(raw["dec_norm_g"]), dec_norm_b=row(raw["dec_norm_b"]),
        out_w=out_w, out_b=out_b,
    )


# --------------------------------------------------------------------------
if __name__ == "__main__":
    vocab_size, d_model, nhead = 50, 32, 4
    num_encoder_layers, num_decoder_layers, dim_feedforward = 2, 2, 64
    B, S, T = 2, 8, 8

    key = jax.random.PRNGKey(0)
    pkey, skey, tkey = jax.random.split(key, 3)
    raw_params = init_params(pkey, vocab_size, d_model, nhead,
                             num_encoder_layers, num_decoder_layers, dim_feedforward)
    params = prepare_params(raw_params, nhead=nhead)

    src = jax.random.randint(skey, (B, S), 0, vocab_size, dtype=jnp.int32)
    tgt = jax.random.randint(tkey, (B, T), 0, vocab_size, dtype=jnp.int32)

    # TODO(synk): dropout (p=0.1) is modeled as identity (inference semantics).
    fwd = jax.jit(partial(transformer_forward, d_model=d_model, nhead=nhead,
                          vocab_size=vocab_size))
    logits = fwd(params, src, tgt)
    jax.block_until_ready(logits)
    assert logits.shape == (B, T, vocab_size)
    assert logits.dtype == jnp.float32
    print("KERNEL_OK")
</pallas_src>

<mosaic_0001>
module attributes {stable_mosaic.version = 11 : i64} {
  func.func @_matmul_kernel(%arg0: i32, %arg1: i32, %arg2: i32, %arg3: memref<16x32xbf16, #tpu.memory_space<vmem>>, %arg4: memref<32x96xbf16, #tpu.memory_space<vmem>>, %arg5: memref<1x96xf32, #tpu.memory_space<vmem>>, %arg6: memref<16x96xbf16, #tpu.memory_space<vmem>>, %arg7: memref<16x96xf32, #tpu.memory_space<vmem>>) attributes {dimension_semantics = [#tpu.dimension_semantics<parallel>, #tpu.dimension_semantics<parallel>, #tpu.dimension_semantics<arbitrary>], iteration_bounds = array<i64: 1, 1, 1>, scalar_prefetch = 0 : i64, scratch_operands = 1 : i64, tpu.core_type = #tpu.core_type<tc>, window_params = [{transform_indices = @transform_0, window_bounds = array<i64: 16, 32>}, {transform_indices = @transform_1, window_bounds = array<i64: 32, 96>}, {transform_indices = @transform_2, window_bounds = array<i64: 1, 96>}, {transform_indices = @transform_3, window_bounds = array<i64: 16, 96>}]} {
    %c0_i32 = arith.constant 0 : i32
    %0 = arith.cmpi eq, %arg2, %c0_i32 : i32
    %1 = arith.extui %0 : i1 to i32
    %c0_i32_0 = arith.constant 0 : i32
    %2 = arith.cmpi ne, %1, %c0_i32_0 : i32
    scf.if %2 {
      %cst_10 = arith.constant 0.000000e+00 : f32
      %12 = vector.broadcast %cst_10 : f32 to vector<16x96xf32>
      %c0_11 = arith.constant 0 : index
      %c0_12 = arith.constant 0 : index
      %13 = vector.load %arg7[%c0_11, %c0_12] : memref<16x96xf32, #tpu.memory_space<vmem>>, vector<16x96xf32>
      tpu.vector_store %arg7[%c0_11, %c0_12], %12 {strides = array<i32>} : memref<16x96xf32, #tpu.memory_space<vmem>>, vector<16x96xf32>,
    } else {
    }
    %c0 = arith.constant 0 : index
    %c0_1 = arith.constant 0 : index
    %3 = vector.load %arg7[%c0, %c0_1] : memref<16x96xf32, #tpu.memory_space<vmem>>, vector<16x96xf32>
    %c0_2 = arith.constant 0 : index
    %c0_3 = arith.constant 0 : index
    %4 = vector.load %arg3[%c0_2, %c0_3] : memref<16x32xbf16, #tpu.memory_space<vmem>>, vector<16x32xbf16>
    %c0_4 = arith.constant 0 : index
    %c0_5 = arith.constant 0 : index
    %5 = vector.load %arg4[%c0_4, %c0_5] : memref<32x96xbf16, #tpu.memory_space<vmem>>, vector<32x96xbf16>
    %cst = arith.constant dense<0.000000e+00> : vector<16x96xf32>
    %6 = tpu.matmul %4, %5, %cst {dimension_numbers = #tpu.dot_dimension_numbers<[1], [0], [0], [1], [0, 0, 1, 1], [], []>} : vector<16x32xbf16>, vector<32x96xbf16>, vector<16x96xf32> -> vector<16x96xf32>
    %7 = arith.addf %3, %6 : vector<16x96xf32>
    %c0_6 = arith.constant 0 : index
    %c0_7 = arith.constant 0 : index
    %8 = vector.load %arg7[%c0_6, %c0_7] : memref<16x96xf32, #tpu.memory_space<vmem>>, vector<16x96xf32>
    tpu.vector_store %arg7[%c0_6, %c0_7], %7 {strides = array<i32>} : memref<16x96xf32, #tpu.memory_space<vmem>>, vector<16x96xf32>,
    %c0_i32_8 = arith.constant 0 : i32
    %9 = arith.cmpi eq, %arg2, %c0_i32_8 : i32
    %10 = arith.extui %9 : i1 to i32
    %c0_i32_9 = arith.constant 0 : i32
    %11 = arith.cmpi ne, %10, %c0_i32_9 : i32
    scf.if %11 {
      %c0_10 = arith.constant 0 : index
      %c0_11 = arith.constant 0 : index
      %12 = vector.load %arg7[%c0_10, %c0_11] : memref<16x96xf32, #tpu.memory_space<vmem>>, vector<16x96xf32>
      %c0_12 = arith.constant 0 : index
      %c0_13 = arith.constant 0 : index
      %13 = vector.load %arg5[%c0_12, %c0_13] : memref<1x96xf32, #tpu.memory_space<vmem>>, vector<1x96xf32>
      %14 = vector.broadcast %13 : vector<1x96xf32> to vector<16x96xf32>
      %15 = arith.addf %12, %14 : vector<16x96xf32>
      %16 = arith.truncf %15 : vector<16x96xf32> to vector<16x96xbf16>
      %c0_14 = arith.constant 0 : index
      %c0_15 = arith.constant 0 : index
      %17 = vector.load %arg6[%c0_14, %c0_15] : memref<16x96xbf16, #tpu.memory_space<vmem>>, vector<16x96xbf16>
      tpu.vector_store %arg6[%c0_14, %c0_15], %16 {strides = array<i32>} : memref<16x96xbf16, #tpu.memory_space<vmem>>, vector<16x96xbf16>,
    } else {
    }
    return
  }
  func.func @transform_0(%arg0: i32, %arg1: i32, %arg2: i32) -> (i32, i32) {
    %c0_i32 = arith.constant 0 : i32
    return %arg0, %arg2 : i32, i32
  }
  func.func @transform_1(%arg0: i32, %arg1: i32, %arg2: i32) -> (i32, i32) {
    %c0_i32 = arith.constant 0 : i32
    return %arg2, %arg1 : i32, i32
  }
  func.func @transform_2(%arg0: i32, %arg1: i32, %arg2: i32) -> (i32, i32) {
    %c0_i32 = arith.constant 0 : i32
    %c0_i32_0 = arith.constant 0 : i32
    return %c0_i32, %arg1 : i32, i32
  }
  func.func @transform_3(%arg0: i32, %arg1: i32, %arg2: i32) -> (i32, i32) {
    %c0_i32 = arith.constant 0 : i32
    return %arg0, %arg1 : i32, i32
  }
}

module attributes {stable_mosaic.version = 11 : i64} {
  func.func @_matmul_kernel(%arg0: i32, %arg1: i32, %arg2: i32, %arg3: memref<16x32xbf16, #tpu.memory_space<vmem>>, %arg4: memref<32x32xbf16, #tpu.memory_space<vmem>>, %arg5: memref<1x32xf32, #tpu.memory_space<vmem>>, %arg6: memref<16x32xbf16, #tpu.memory_space<vmem>>, %arg7: memref<16x32xf32, #tpu.memory_space<vmem>>) attributes {dimension_semantics = [#tpu.dimension_semantics<parallel>, #tpu.dimension_semantics<parallel>, #tpu.dimension_semantics<arbitrary>], iteration_bounds = array<i64: 1, 1, 1>, scalar_prefetch = 0 : i64, scratch_operands = 1 : i64, tpu.core_type = #tpu.core_type<tc>, window_params = [{transform_indices = @transform_0, window_bounds = array<i64: 16, 32>}, {transform_indices = @transform_1, window_bounds = array<i64: 32, 32>}, {transform_indices = @transform_2, window_bounds = array<i64: 1, 32>}, {transform_indices = @transform_3, window_bounds = array<i64: 16, 32>}]} {
    %c0_i32 = arith.constant 0 : i32
    %0 = arith.cmpi eq, %arg2, %c0_i32 : i32
    %1 = arith.extui %0 : i1 to i32
    %c0_i32_0 = arith.constant 0 : i32
    %2 = arith.cmpi ne, %1, %c0_i32_0 : i32
    scf.if %2 {
      %cst_10 = arith.constant 0.000000e+00 : f32
      %12 = vector.broadcast %cst_10 : f32 to vector<16x32xf32>
      %c0_11 = arith.constant 0 : index
      %c0_12 = arith.constant 0 : index
      %13 = vector.load %arg7[%c0_11, %c0_12] : memref<16x32xf32, #tpu.memory_space<vmem>>, vector<16x32xf32>
      tpu.vector_store %arg7[%c0_11, %c0_12], %12 {strides = array<i32>} : memref<16x32xf32, #tpu.memory_space<vmem>>, vector<16x32xf32>,
    } else {
    }
    %c0 = arith.constant 0 : index
    %c0_1 = arith.constant 0 : index
    %3 = vector.load %arg7[%c0, %c0_1] : memref<16x32xf32, #tpu.memory_space<vmem>>, vector<16x32xf32>
    %c0_2 = arith.constant 0 : index
    %c0_3 = arith.constant 0 : index
    %4 = vector.load %arg3[%c0_2, %c0_3] : memref<16x32xbf16, #tpu.memory_space<vmem>>, vector<16x32xbf16>
    %c0_4 = arith.constant 0 : index
    %c0_5 = arith.constant 0 : index
    %5 = vector.load %arg4[%c0_4, %c0_5] : memref<32x32xbf16, #tpu.memory_space<vmem>>, vector<32x32xbf16>
    %cst = arith.constant dense<0.000000e+00> : vector<16x32xf32>
    %6 = tpu.matmul %4, %5, %cst {dimension_numbers = #tpu.dot_dimension_numbers<[1], [0], [0], [1], [0, 0, 1, 1], [], []>} : vector<16x32xbf16>, vector<32x32xbf16>, vector<16x32xf32> -> vector<16x32xf32>
    %7 = arith.addf %3, %6 : vector<16x32xf32>
    %c0_6 = arith.constant 0 : index
    %c0_7 = arith.constant 0 : index
    %8 = vector.load %arg7[%c0_6, %c0_7] : memref<16x32xf32, #tpu.memory_space<vmem>>, vector<16x32xf32>
    tpu.vector_store %arg7[%c0_6, %c0_7], %7 {strides = array<i32>} : memref<16x32xf32, #tpu.memory_space<vmem>>, vector<16x32xf32>,
    %c0_i32_8 = arith.constant 0 : i32
    %9 = arith.cmpi eq, %arg2, %c0_i32_8 : i32
    %10 = arith.extui %9 : i1 to i32
    %c0_i32_9 = arith.constant 0 : i32
    %11 = arith.cmpi ne, %10, %c0_i32_9 : i32
    scf.if %11 {
      %c0_10 = arith.constant 0 : index
      %c0_11 = arith.constant 0 : index
      %12 = vector.load %arg7[%c0_10, %c0_11] : memref<16x32xf32, #tpu.memory_space<vmem>>, vector<16x32xf32>
      %c0_12 = arith.constant 0 : index
      %c0_13 = arith.constant 0 : index
      %13 = vector.load %arg5[%c0_12, %c0_13] : memref<1x32xf32, #tpu.memory_space<vmem>>, vector<1x32xf32>
      %14 = vector.broadcast %13 : vector<1x32xf32> to vector<16x32xf32>
      %15 = arith.addf %12, %14 : vector<16x32xf32>
      %16 = arith.truncf %15 : vector<16x32xf32> to vector<16x32xbf16>
      %c0_14 = arith.constant 0 : index
      %c0_15 = arith.constant 0 : index
      %17 = vector.load %arg6[%c0_14, %c0_15] : memref<16x32xbf16, #tpu.memory_space<vmem>>, vector<16x32xbf16>
      tpu.vector_store %arg6[%c0_14, %c0_15], %16 {strides = array<i32>} : memref<16x32xbf16, #tpu.memory_space<vmem>>, vector<16x32xbf16>,
    } else {
    }
    return
  }
  func.func @transform_0(%arg0: i32, %arg1: i32, %arg2: i32) -> (i32, i32) {
    %c0_i32 = arith.constant 0 : i32
    return %arg0, %arg2 : i32, i32
  }
  func.func @transform_1(%arg0: i32, %arg1: i32, %arg2: i32) -> (i32, i32) {
    %c0_i32 = arith.constant 0 : i32
    return %arg2, %arg1 : i32, i32
  }
  func.func @transform_2(%arg0: i32, %arg1: i32, %arg2: i32) -> (i32, i32) {
    %c0_i32 = arith.constant 0 : i32
    %c0_i32_0 = arith.constant 0 : i32
    return %c0_i32, %arg1 : i32, i32
  }
  func.func @transform_3(%arg0: i32, %arg1: i32, %arg2: i32) -> (i32, i32) {
    %c0_i32 = arith.constant 0 : i32
    return %arg0, %arg1 : i32, i32
  }
}

module attributes {stable_mosaic.version = 11 : i64} {
  func.func @_attn_kernel(%arg0: i32, %arg1: i32, %arg2: i32, %arg3: memref<1x1x8x8xbf16, #tpu.memory_space<vmem>>, %arg4: memref<1x1x8x8xbf16, #tpu.memory_space<vmem>>, %arg5: memref<1x1x8x8xbf16, #tpu.memory_space<vmem>>, %arg6: memref<1x8x32xbf16, #tpu.memory_space<vmem>>, %arg7: memref<1x8x32xbf16, #tpu.memory_space<vmem>>, %arg8: memref<1x32xf32, #tpu.memory_space<vmem>>, %arg9: memref<1x32xf32, #tpu.memory_space<vmem>>, %arg10: memref<1x32xf32, #tpu.memory_space<vmem>>, %arg11: memref<1x8x32xbf16, #tpu.memory_space<vmem>>, %arg12: memref<8x32xf32, #tpu.memory_space<vmem>>) attributes {dimension_semantics = [#tpu.dimension_semantics<parallel>, #tpu.dimension_semantics<parallel>, #tpu.dimension_semantics<arbitrary>], iteration_bounds = array<i64: 2, 1, 4>, scalar_prefetch = 0 : i64, scratch_operands = 1 : i64, tpu.core_type = #tpu.core_type<tc>, window_params = [{transform_indices = @transform_0, window_bounds = array<i64: 1, 1, 8, 8>}, {transform_indices = @transform_1, window_bounds = array<i64: 1, 1, 8, 8>}, {transform_indices = @transform_2, window_bounds = array<i64: 1, 1, 8, 8>}, {transform_indices = @transform_3, window_bounds = array<i64: 1, 8, 32>}, {transform_indices = @transform_4, window_bounds = array<i64: 1, 8, 32>}, {pipeline_mode = #tpu.pipeline_mode<synchronous>, transform_indices = @transform_5, window_bounds = array<i64: 1, 32>}, {pipeline_mode = #tpu.pipeline_mode<synchronous>, transform_indices = @transform_6, window_bounds = array<i64: 1, 32>}, {pipeline_mode = #tpu.pipeline_mode<synchronous>, transform_indices = @transform_7, window_bounds = array<i64: 1, 32>}, {transform_indices = @transform_8, window_bounds = array<i64: 1, 8, 32>}]} {
    %c0_i32 = arith.constant 0 : i32
    %0 = arith.cmpi eq, %arg2, %c0_i32 : i32
    %1 = arith.extui %0 : i1 to i32
    %c0_i32_0 = arith.constant 0 : i32
    %2 = arith.cmpi ne, %1, %c0_i32_0 : i32
    scf.if %2 {
      %cst_25 = arith.constant 0.000000e+00 : f32
      %34 = vector.broadcast %cst_25 : f32 to vector<8x32xf32>
      %c0_26 = arith.constant 0 : index
      %c0_27 = arith.constant 0 : index
      %35 = vector.load %arg12[%c0_26, %c0_27] : memref<8x32xf32, #tpu.memory_space<vmem>>, vector<8x32xf32>
      tpu.vector_store %arg12[%c0_26, %c0_27], %34 {strides = array<i32>} : memref<8x32xf32, #tpu.memory_space<vmem>>, vector<8x32xf32>,
    } else {
    }
    %c0 = arith.constant 0 : index
    %c0_1 = arith.constant 0 : index
    %c0_2 = arith.constant 0 : index
    %c0_3 = arith.constant 0 : index
    %3 = vector.load %arg3[%c0, %c0_1, %c0_2, %c0_3] : memref<1x1x8x8xbf16, #tpu.memory_space<vmem>>, vector<1x1x8x8xbf16>
    %4 = vector.shape_cast %3 : vector<1x1x8x8xbf16> to vector<8x8xbf16>
    %c0_4 = arith.constant 0 : index
    %c0_5 = arith.constant 0 : index
    %c0_6 = arith.constant 0 : index
    %c0_7 = arith.constant 0 : index
    %5 = vector.load %arg4[%c0_4, %c0_5, %c0_6, %c0_7] : memref<1x1x8x8xbf16, #tpu.memory_space<vmem>>, vector<1x1x8x8xbf16>
    %6 = vector.shape_cast %5 : vector<1x1x8x8xbf16> to vector<8x8xbf16>
    %c0_8 = arith.constant 0 : index
    %c0_9 = arith.constant 0 : index
    %c0_10 = arith.constant 0 : index
    %c0_11 = arith.constant 0 : index
    %7 = vector.load %arg5[%c0_8, %c0_9, %c0_10, %c0_11] : memref<1x1x8x8xbf16, #tpu.memory_space<vmem>>, vector<1x1x8x8xbf16>
    %8 = vector.shape_cast %7 : vector<1x1x8x8xbf16> to vector<8x8xbf16>
    %cst = arith.constant dense<0.000000e+00> : vector<8x8xf32>
    %9 = tpu.matmul %4, %6, %cst {dimension_numbers = #tpu.dot_dimension_numbers<[1], [1], [0], [0], [0, 0, 1, 0], [], []>} : vector<8x8xbf16>, vector<8x8xbf16>, vector<8x8xf32> -> vector<8x8xf32>
    %cst_12 = arith.constant 0.353553385 : f32
    %10 = vector.broadcast %cst_12 : f32 to vector<8x8xf32>
    %11 = arith.mulf %9, %10 : vector<8x8xf32>
    %cst_13 = arith.constant dense<0xFF800000> : vector<8xf32>
    %12 = vector.multi_reduction <maximumf>, %11, %cst_13 [1] : vector<8x8xf32> to vector<8xf32>
    %13 = vector.shape_cast %12 : vector<8xf32> to vector<8x1xf32>
    %14 = vector.broadcast %13 : vector<8x1xf32> to vector<8x8xf32>
    %15 = arith.subf %11, %14 : vector<8x8xf32>
    %16 = math.exp %15 : vector<8x8xf32>
    %cst_14 = arith.constant dense<0.000000e+00> : vector<8xf32>
    %17 = vector.multi_reduction <add>, %16, %cst_14 [1] : vector<8x8xf32> to vector<8xf32>
    %18 = vector.shape_cast %17 : vector<8xf32> to vector<8x1xf32>
    %19 = tpu.reciprocal %18 {approx = true} : vector<8x1xf32> -> vector<8x1xf32>
    %20 = vector.broadcast %19 : vector<8x1xf32> to vector<8x8xf32>
    %21 = arith.mulf %16, %20 : vector<8x8xf32>
    %22 = arith.truncf %21 : vector<8x8xf32> to vector<8x8xbf16>
    %cst_15 = arith.constant dense<0.000000e+00> : vector<8x8xf32>
    %23 = tpu.matmul %22, %8, %cst_15 {dimension_numbers = #tpu.dot_dimension_numbers<[1], [0], [0], [1], [0, 0, 1, 1], [], []>} : vector<8x8xbf16>, vector<8x8xbf16>, vector<8x8xf32> -> vector<8x8xf32>
    %c0_16 = arith.constant 0 : index
    %c0_17 = arith.constant 0 : index
    %24 = vector.load %arg12[%c0_16, %c0_17] : memref<8x32xf32, #tpu.memory_space<vmem>>, vector<8x32xf32>
    %25 = arith.truncf %23 : vector<8x8xf32> to vector<8x8xbf16>
    %c0_18 = arith.constant 0 : index
    %c0_19 = arith.constant 0 : index
    %c0_20 = arith.constant 0 : index
    %26 = vector.load %arg7[%c0_18, %c0_19, %c0_20] : memref<1x8x32xbf16, #tpu.memory_space<vmem>>, vector<1x8x32xbf16>
    %27 = vector.shape_cast %26 : vector<1x8x32xbf16> to vector<8x32xbf16>
    %cst_21 = arith.constant dense<0.000000e+00> : vector<8x32xf32>
    %28 = tpu.matmul %25, %27, %cst_21 {dimension_numbers = #tpu.dot_dimension_numbers<[1], [0], [0], [1], [0, 0, 1, 1], [], []>} : vector<8x8xbf16>, vector<8x32xbf16>, vector<8x32xf32> -> vector<8x32xf32>
    %29 = arith.addf %24, %28 : vector<8x32xf32>
    %c0_22 = arith.constant 0 : index
    %c0_23 = arith.constant 0 : index
    %30 = vector.load %arg12[%c0_22, %c0_23] : memref<8x32xf32, #tpu.memory_space<vmem>>, vector<8x32xf32>
    tpu.vector_store %arg12[%c0_22, %c0_23], %29 {strides = array<i32>} : memref<8x32xf32, #tpu.memory_space<vmem>>, vector<8x32xf32>,
    %c3_i32 = arith.constant 3 : i32
    %31 = arith.cmpi eq, %arg2, %c3_i32 : i32
    %32 = arith.extui %31 : i1 to i32
    %c0_i32_24 = arith.constant 0 : i32
    %33 = arith.cmpi ne, %32, %c0_i32_24 : i32
    scf.if %33 {
      %c0_25 = arith.constant 0 : index
      %c0_26 = arith.constant 0 : index
      %34 = vector.load %arg12[%c0_25, %c0_26] : memref<8x32xf32, #tpu.memory_space<vmem>>, vector<8x32xf32>
      %c0_27 = arith.constant 0 : index
      %c0_28 = arith.constant 0 : index
      %35 = vector.load %arg8[%c0_27, %c0_28] : memref<1x32xf32, #tpu.memory_space<vmem>>, vector<1x32xf32>
      %36 = vector.broadcast %35 : vector<1x32xf32> to vector<8x32xf32>
      %37 = arith.addf %34, %36 : vector<8x32xf32>
      %c0_29 = arith.constant 0 : index
      %c0_30 = arith.constant 0 : index
      %c0_31 = arith.constant 0 : index
      %38 = vector.load %arg6[%c0_29, %c0_30, %c0_31] : memref<1x8x32xbf16, #tpu.memory_space<vmem>>, vector<1x8x32xbf16>
      %39 = vector.shape_cast %38 : vector<1x8x32xbf16> to vector<8x32xbf16>
      %40 = arith.extf %39 : vector<8x32xbf16> to vector<8x32xf32>
      %41 = arith.addf %40, %37 : vector<8x32xf32>
      %c0_32 = arith.constant 0 : index
      %c0_33 = arith.constant 0 : index
      %42 = vector.load %arg9[%c0_32, %c0_33] : memref<1x32xf32, #tpu.memory_space<vmem>>, vector<1x32xf32>
      %c0_34 = arith.constant 0 : index
      %c0_35 = arith.constant 0 : index
      %43 = vector.load %arg10[%c0_34, %c0_35] : memref<1x32xf32, #tpu.memory_space<vmem>>, vector<1x32xf32>
      %cst_36 = arith.constant dense<0.000000e+00> : vector<8xf32>
      %44 = vector.multi_reduction <add>, %41, %cst_36 [1] : vector<8x32xf32> to vector<8xf32>
      %45 = vector.shape_cast %44 : vector<8xf32> to vector<8x1xf32>
      %cst_37 = arith.constant 3.200000e+01 : f32
      %46 = vector.broadcast %cst_37 : f32 to vector<8x1xf32>
      %47 = arith.divf %45, %46 : vector<8x1xf32>
      %48 = vector.broadcast %47 : vector<8x1xf32> to vector<8x32xf32>
      %49 = arith.subf %41, %48 : vector<8x32xf32>
      %50 = arith.mulf %49, %49 : vector<8x32xf32>
      %cst_38 = arith.constant dense<0.000000e+00> : vector<8xf32>
      %51 = vector.multi_reduction <add>, %50, %cst_38 [1] : vector<8x32xf32> to vector<8xf32>
      %52 = vector.shape_cast %51 : vector<8xf32> to vector<8x1xf32>
      %cst_39 = arith.constant 3.200000e+01 : f32
      %53 = vector.broadcast %cst_39 : f32 to vector<8x1xf32>
      %54 = arith.divf %52, %53 : vector<8x1xf32>
      %55 = vector.broadcast %47 : vector<8x1xf32> to vector<8x32xf32>
      %56 = arith.subf %41, %55 : vector<8x32xf32>
      %cst_40 = arith.constant 9.99999974E-6 : f32
      %57 = vector.broadcast %cst_40 : f32 to vector<8x1xf32>
      %58 = arith.addf %54, %57 : vector<8x1xf32>
      %59 = math.rsqrt %58 : vector<8x1xf32>
      %60 = vector.broadcast %59 : vector<8x1xf32> to vector<8x32xf32>
      %61 = arith.mulf %56, %60 : vector<8x32xf32>
      %62 = vector.broadcast %42 : vector<1x32xf32> to vector<8x32xf32>
      %63 = arith.mulf %61, %62 : vector<8x32xf32>
      %64 = vector.broadcast %43 : vector<1x32xf32> to vector<8x32xf32>
      %65 = arith.addf %63, %64 : vector<8x32xf32>
      %66 = arith.truncf %65 : vector<8x32xf32> to vector<8x32xbf16>
      %c0_41 = arith.constant 0 : index
      %c0_42 = arith.constant 0 : index
      %c0_43 = arith.constant 0 : index
      %67 = vector.load %arg11[%c0_41, %c0_42, %c0_43] : memref<1x8x32xbf16, #tpu.memory_space<vmem>>, vector<1x8x32xbf16>
      %68 = vector.shape_cast %67 : vector<1x8x32xbf16> to vector<8x32xbf16>
      %69 = vector.shape_cast %66 : vector<8x32xbf16> to vector<1x8x32xbf16>
      tpu.vector_store %arg11[%c0_41, %c0_42, %c0_43], %69 {strides = array<i32>} : memref<1x8x32xbf16, #tpu.memory_space<vmem>>, vector<1x8x32xbf16>,
    } else {
    }
    return
  }
  func.func @transform_0(%arg0: i32, %arg1: i32, %arg2: i32) -> (i32, i32, i32, i32) {
    %c0_i32 = arith.constant 0 : i32
    %c0_i32_0 = arith.constant 0 : i32
    return %arg0, %arg2, %arg1, %c0_i32 : i32, i32, i32, i32
  }
  func.func @transform_1(%arg0: i32, %arg1: i32, %arg2: i32) -> (i32, i32, i32, i32) {
    %c0_i32 = arith.constant 0 : i32
    %c0_i32_0 = arith.constant 0 : i32
    %c0_i32_1 = arith.constant 0 : i32
    return %arg0, %arg2, %c0_i32, %c0_i32_0 : i32, i32, i32, i32
  }
  func.func @transform_2(%arg0: i32, %arg1: i32, %arg2: i32) -> (i32, i32, i32, i32) {
    %c0_i32 = arith.constant 0 : i32
    %c0_i32_0 = arith.constant 0 : i32
    %c0_i32_1 = arith.constant 0 : i32
    return %arg0, %arg2, %c0_i32, %c0_i32_0 : i32, i32, i32, i32
  }
  func.func @transform_3(%arg0: i32, %arg1: i32, %arg2: i32) -> (i32, i32, i32) {
    %c0_i32 = arith.constant 0 : i32
    %c0_i32_0 = arith.constant 0 : i32
    return %arg0, %arg1, %c0_i32 : i32, i32, i32
  }
  func.func @transform_4(%arg0: i32, %arg1: i32, %arg2: i32) -> (i32, i32, i32) {
    %c0_i32 = arith.constant 0 : i32
    %c0_i32_0 = arith.constant 0 : i32
    %c0_i32_1 = arith.constant 0 : i32
    return %arg2, %c0_i32, %c0_i32_0 : i32, i32, i32
  }
  func.func @transform_5(%arg0: i32, %arg1: i32, %arg2: i32) -> (i32, i32) {
    %c0_i32 = arith.constant 0 : i32
    %c0_i32_0 = arith.constant 0 : i32
    %c0_i32_1 = arith.constant 0 : i32
    return %c0_i32, %c0_i32_0 : i32, i32
  }
  func.func @transform_6(%arg0: i32, %arg1: i32, %arg2: i32) -> (i32, i32) {
    %c0_i32 = arith.constant 0 : i32
    %c0_i32_0 = arith.constant 0 : i32
    %c0_i32_1 = arith.constant 0 : i32
    return %c0_i32, %c0_i32_0 : i32, i32
  }
  func.func @transform_7(%arg0: i32, %arg1: i32, %arg2: i32) -> (i32, i32) {
    %c0_i32 = arith.constant 0 : i32
    %c0_i32_0 = arith.constant 0 : i32
    %c0_i32_1 = arith.constant 0 : i32
    return %c0_i32, %c0_i32_0 : i32, i32
  }
  func.func @transform_8(%arg0: i32, %arg1: i32, %arg2: i32) -> (i32, i32, i32) {
    %c0_i32 = arith.constant 0 : i32
    %c0_i32_0 = arith.constant 0 : i32
    return %arg0, %arg1, %c0_i32 : i32, i32, i32
  }
}

module attributes {stable_mosaic.version = 11 : i64} {
  func.func @_ffn_kernel(%arg0: i32, %arg1: memref<16x32xbf16, #tpu.memory_space<vmem>>, %arg2: memref<32x64xbf16, #tpu.memory_space<vmem>>, %arg3: memref<1x64xf32, #tpu.memory_space<vmem>>, %arg4: memref<64x32xbf16, #tpu.memory_space<vmem>>, %arg5: memref<1x32xf32, #tpu.memory_space<vmem>>, %arg6: memref<1x32xf32, #tpu.memory_space<vmem>>, %arg7: memref<1x32xf32, #tpu.memory_space<vmem>>, %arg8: memref<16x32xbf16, #tpu.memory_space<vmem>>) attributes {dimension_semantics = [#tpu.dimension_semantics<parallel>], iteration_bounds = array<i64: 1>, scalar_prefetch = 0 : i64, scratch_operands = 0 : i64, tpu.core_type = #tpu.core_type<tc>, window_params = [{transform_indices = @transform_0, window_bounds = array<i64: 16, 32>}, {pipeline_mode = #tpu.pipeline_mode<synchronous>, transform_indices = @transform_1, window_bounds = array<i64: 32, 64>}, {pipeline_mode = #tpu.pipeline_mode<synchronous>, transform_indices = @transform_2, window_bounds = array<i64: 1, 64>}, {pipeline_mode = #tpu.pipeline_mode<synchronous>, transform_indices = @transform_3, window_bounds = array<i64: 64, 32>}, {pipeline_mode = #tpu.pipeline_mode<synchronous>, transform_indices = @transform_4, window_bounds = array<i64: 1, 32>}, {pipeline_mode = #tpu.pipeline_mode<synchronous>, transform_indices = @transform_5, window_bounds = array<i64: 1, 32>}, {pipeline_mode = #tpu.pipeline_mode<synchronous>, transform_indices = @transform_6, window_bounds = array<i64: 1, 32>}, {transform_indices = @transform_7, window_bounds = array<i64: 16, 32>}]} {
    %c0 = arith.constant 0 : index
    %c0_0 = arith.constant 0 : index
    %0 = vector.load %arg1[%c0, %c0_0] : memref<16x32xbf16, #tpu.memory_space<vmem>>, vector<16x32xbf16>
    %c0_1 = arith.constant 0 : index
    %c0_2 = arith.constant 0 : index
    %1 = vector.load %arg2[%c0_1, %c0_2] : memref<32x64xbf16, #tpu.memory_space<vmem>>, vector<32x64xbf16>
    %cst = arith.constant dense<0.000000e+00> : vector<16x64xf32>
    %2 = tpu.matmul %0, %1, %cst {dimension_numbers = #tpu.dot_dimension_numbers<[1], [0], [0], [1], [0, 0, 1, 1], [], []>} : vector<16x32xbf16>, vector<32x64xbf16>, vector<16x64xf32> -> vector<16x64xf32>
    %c0_3 = arith.constant 0 : index
    %c0_4 = arith.constant 0 : index
    %3 = vector.load %arg3[%c0_3, %c0_4] : memref<1x64xf32, #tpu.memory_space<vmem>>, vector<1x64xf32>
    %4 = vector.broadcast %3 : vector<1x64xf32> to vector<16x64xf32>
    %5 = arith.addf %2, %4 : vector<16x64xf32>
    %cst_5 = arith.constant 0.000000e+00 : f32
    %6 = vector.broadcast %cst_5 : f32 to vector<16x64xf32>
    %7 = arith.maximumf %5, %6 : vector<16x64xf32>
    %8 = arith.truncf %7 : vector<16x64xf32> to vector<16x64xbf16>
    %c0_6 = arith.constant 0 : index
    %c0_7 = arith.constant 0 : index
    %9 = vector.load %arg4[%c0_6, %c0_7] : memref<64x32xbf16, #tpu.memory_space<vmem>>, vector<64x32xbf16>
    %cst_8 = arith.constant dense<0.000000e+00> : vector<16x32xf32>
    %10 = tpu.matmul %8, %9, %cst_8 {dimension_numbers = #tpu.dot_dimension_numbers<[1], [0], [0], [1], [0, 0, 1, 1], [], []>} : vector<16x64xbf16>, vector<64x32xbf16>, vector<16x32xf32> -> vector<16x32xf32>
    %c0_9 = arith.constant 0 : index
    %c0_10 = arith.constant 0 : index
    %11 = vector.load %arg5[%c0_9, %c0_10] : memref<1x32xf32, #tpu.memory_space<vmem>>, vector<1x32xf32>
    %12 = vector.broadcast %11 : vector<1x32xf32> to vector<16x32xf32>
    %13 = arith.addf %10, %12 : vector<16x32xf32>
    %14 = arith.extf %0 : vector<16x32xbf16> to vector<16x32xf32>
    %15 = arith.addf %14, %13 : vector<16x32xf32>
    %c0_11 = arith.constant 0 : index
    %c0_12 = arith.constant 0 : index
    %16 = vector.load %arg6[%c0_11, %c0_12] : memref<1x32xf32, #tpu.memory_space<vmem>>, vector<1x32xf32>
    %c0_13 = arith.constant 0 : index
    %c0_14 = arith.constant 0 : index
    %17 = vector.load %arg7[%c0_13, %c0_14] : memref<1x32xf32, #tpu.memory_space<vmem>>, vector<1x32xf32>
    %cst_15 = arith.constant dense<0.000000e+00> : vector<16xf32>
    %18 = vector.multi_reduction <add>, %15, %cst_15 [1] : vector<16x32xf32> to vector<16xf32>
    %19 = vector.shape_cast %18 : vector<16xf32> to vector<16x1xf32>
    %cst_16 = arith.constant 3.200000e+01 : f32
    %20 = vector.broadcast %cst_16 : f32 to vector<16x1xf32>
    %21 = arith.divf %19, %20 : vector<16x1xf32>
    %22 = vector.broadcast %21 : vector<16x1xf32> to vector<16x32xf32>
    %23 = arith.subf %15, %22 : vector<16x32xf32>
    %24 = arith.mulf %23, %23 : vector<16x32xf32>
    %cst_17 = arith.constant dense<0.000000e+00> : vector<16xf32>
    %25 = vector.multi_reduction <add>, %24, %cst_17 [1] : vector<16x32xf32> to vector<16xf32>
    %26 = vector.shape_cast %25 : vector<16xf32> to vector<16x1xf32>
    %cst_18 = arith.constant 3.200000e+01 : f32
    %27 = vector.broadcast %cst_18 : f32 to vector<16x1xf32>
    %28 = arith.divf %26, %27 : vector<16x1xf32>
    %29 = vector.broadcast %21 : vector<16x1xf32> to vector<16x32xf32>
    %30 = arith.subf %15, %29 : vector<16x32xf32>
    %cst_19 = arith.constant 9.99999974E-6 : f32
    %31 = vector.broadcast %cst_19 : f32 to vector<16x1xf32>
    %32 = arith.addf %28, %31 : vector<16x1xf32>
    %33 = math.rsqrt %32 : vector<16x1xf32>
    %34 = vector.broadcast %33 : vector<16x1xf32> to vector<16x32xf32>
    %35 = arith.mulf %30, %34 : vector<16x32xf32>
    %36 = vector.broadcast %16 : vector<1x32xf32> to vector<16x32xf32>
    %37 = arith.mulf %35, %36 : vector<16x32xf32>
    %38 = vector.broadcast %17 : vector<1x32xf32> to vector<16x32xf32>
    %39 = arith.addf %37, %38 : vector<16x32xf32>
    %40 = arith.truncf %39 : vector<16x32xf32> to vector<16x32xbf16>
    %c0_20 = arith.constant 0 : index
    %c0_21 = arith.constant 0 : index
    %41 = vector.load %arg8[%c0_20, %c0_21] : memref<16x32xbf16, #tpu.memory_space<vmem>>, vector<16x32xbf16>
    tpu.vector_store %arg8[%c0_20, %c0_21], %40 {strides = array<i32>} : memref<16x32xbf16, #tpu.memory_space<vmem>>, vector<16x32xbf16>,
    return
  }
  func.func @transform_0(%arg0: i32) -> (i32, i32) {
    %c0_i32 = arith.constant 0 : i32
    %c0_i32_0 = arith.constant 0 : i32
    return %arg0, %c0_i32 : i32, i32
  }
  func.func @transform_1(%arg0: i32) -> (i32, i32) {
    %c0_i32 = arith.constant 0 : i32
    %c0_i32_0 = arith.constant 0 : i32
    %c0_i32_1 = arith.constant 0 : i32
    return %c0_i32, %c0_i32_0 : i32, i32
  }
  func.func @transform_2(%arg0: i32) -> (i32, i32) {
    %c0_i32 = arith.constant 0 : i32
    %c0_i32_0 = arith.constant 0 : i32
    %c0_i32_1 = arith.constant 0 : i32
    return %c0_i32, %c0_i32_0 : i32, i32
  }
  func.func @transform_3(%arg0: i32) -> (i32, i32) {
    %c0_i32 = arith.constant 0 : i32
    %c0_i32_0 = arith.constant 0 : i32
    %c0_i32_1 = arith.constant 0 : i32
    return %c0_i32, %c0_i32_0 : i32, i32
  }
  func.func @transform_4(%arg0: i32) -> (i32, i32) {
    %c0_i32 = arith.constant 0 : i32
    %c0_i32_0 = arith.constant 0 : i32
    %c0_i32_1 = arith.constant 0 : i32
    return %c0_i32, %c0_i32_0 : i32, i32
  }
  func.func @transform_5(%arg0: i32) -> (i32, i32) {
    %c0_i32 = arith.constant 0 : i32
    %c0_i32_0 = arith.constant 0 : i32
    %c0_i32_1 = arith.constant 0 : i32
    return %c0_i32, %c0_i32_0 : i32, i32
  }
  func.func @transform_6(%arg0: i32) -> (i32, i32) {
    %c0_i32 = arith.constant 0 : i32
    %c0_i32_0 = arith.constant 0 : i32
    %c0_i32_1 = arith.constant 0 : i32
    return %c0_i32, %c0_i32_0 : i32, i32
  }
  func.func @transform_7(%arg0: i32) -> (i32, i32) {
    %c0_i32 = arith.constant 0 : i32
    %c0_i32_0 = arith.constant 0 : i32
    return %arg0, %c0_i32 : i32, i32
  }
}

module attributes {stable_mosaic.version = 11 : i64} {
  func.func @_ln_kernel(%arg0: i32, %arg1: memref<16x32xbf16, #tpu.memory_space<vmem>>, %arg2: memref<1x32xf32, #tpu.memory_space<vmem>>, %arg3: memref<1x32xf32, #tpu.memory_space<vmem>>, %arg4: memref<16x32xbf16, #tpu.memory_space<vmem>>) attributes {dimension_semantics = [#tpu.dimension_semantics<parallel>], iteration_bounds = array<i64: 1>, scalar_prefetch = 0 : i64, scratch_operands = 0 : i64, tpu.core_type = #tpu.core_type<tc>, window_params = [{transform_indices = @transform_0, window_bounds = array<i64: 16, 32>}, {pipeline_mode = #tpu.pipeline_mode<synchronous>, transform_indices = @transform_1, window_bounds = array<i64: 1, 32>}, {pipeline_mode = #tpu.pipeline_mode<synchronous>, transform_indices = @transform_2, window_bounds = array<i64: 1, 32>}, {transform_indices = @transform_3, window_bounds = array<i64: 16, 32>}]} {
    %c0 = arith.constant 0 : index
    %c0_0 = arith.constant 0 : index
    %0 = vector.load %arg1[%c0, %c0_0] : memref<16x32xbf16, #tpu.memory_space<vmem>>, vector<16x32xbf16>
    %1 = arith.extf %0 : vector<16x32xbf16> to vector<16x32xf32>
    %c0_1 = arith.constant 0 : index
    %c0_2 = arith.constant 0 : index
    %2 = vector.load %arg2[%c0_1, %c0_2] : memref<1x32xf32, #tpu.memory_space<vmem>>, vector<1x32xf32>
    %c0_3 = arith.constant 0 : index
    %c0_4 = arith.constant 0 : index
    %3 = vector.load %arg3[%c0_3, %c0_4] : memref<1x32xf32, #tpu.memory_space<vmem>>, vector<1x32xf32>
    %cst = arith.constant dense<0.000000e+00> : vector<16xf32>
    %4 = vector.multi_reduction <add>, %1, %cst [1] : vector<16x32xf32> to vector<16xf32>
    %5 = vector.shape_cast %4 : vector<16xf32> to vector<16x1xf32>
    %cst_5 = arith.constant 3.200000e+01 : f32
    %6 = vector.broadcast %cst_5 : f32 to vector<16x1xf32>
    %7 = arith.divf %5, %6 : vector<16x1xf32>
    %8 = vector.broadcast %7 : vector<16x1xf32> to vector<16x32xf32>
    %9 = arith.subf %1, %8 : vector<16x32xf32>
    %10 = arith.mulf %9, %9 : vector<16x32xf32>
    %cst_6 = arith.constant dense<0.000000e+00> : vector<16xf32>
    %11 = vector.multi_reduction <add>, %10, %cst_6 [1] : vector<16x32xf32> to vector<16xf32>
    %12 = vector.shape_cast %11 : vector<16xf32> to vector<16x1xf32>
    %cst_7 = arith.constant 3.200000e+01 : f32
    %13 = vector.broadcast %cst_7 : f32 to vector<16x1xf32>
    %14 = arith.divf %12, %13 : vector<16x1xf32>
    %15 = vector.broadcast %7 : vector<16x1xf32> to vector<16x32xf32>
    %16 = arith.subf %1, %15 : vector<16x32xf32>
    %cst_8 = arith.constant 9.99999974E-6 : f32
    %17 = vector.broadcast %cst_8 : f32 to vector<16x1xf32>
    %18 = arith.addf %14, %17 : vector<16x1xf32>
    %19 = math.rsqrt %18 : vector<16x1xf32>
    %20 = vector.broadcast %19 : vector<16x1xf32> to vector<16x32xf32>
    %21 = arith.mulf %16, %20 : vector<16x32xf32>
    %22 = vector.broadcast %2 : vector<1x32xf32> to vector<16x32xf32>
    %23 = arith.mulf %21, %22 : vector<16x32xf32>
    %24 = vector.broadcast %3 : vector<1x32xf32> to vector<16x32xf32>
    %25 = arith.addf %23, %24 : vector<16x32xf32>
    %26 = arith.truncf %25 : vector<16x32xf32> to vector<16x32xbf16>
    %c0_9 = arith.constant 0 : index
    %c0_10 = arith.constant 0 : index
    %27 = vector.load %arg4[%c0_9, %c0_10] : memref<16x32xbf16, #tpu.memory_space<vmem>>, vector<16x32xbf16>
    tpu.vector_store %arg4[%c0_9, %c0_10], %26 {strides = array<i32>} : memref<16x32xbf16, #tpu.memory_space<vmem>>, vector<16x32xbf16>,
    return
  }
  func.func @transform_0(%arg0: i32) -> (i32, i32) {
    %c0_i32 = arith.constant 0 : i32
    %c0_i32_0 = arith.constant 0 : i32
    return %arg0, %c0_i32 : i32, i32
  }
  func.func @transform_1(%arg0: i32) -> (i32, i32) {
    %c0_i32 = arith.constant 0 : i32
    %c0_i32_0 = arith.constant 0 : i32
    %c0_i32_1 = arith.constant 0 : i32
    return %c0_i32, %c0_i32_0 : i32, i32
  }
  func.func @transform_2(%arg0: i32) -> (i32, i32) {
    %c0_i32 = arith.constant 0 : i32
    %c0_i32_0 = arith.constant 0 : i32
    %c0_i32_1 = arith.constant 0 : i32
    return %c0_i32, %c0_i32_0 : i32, i32
  }
  func.func @transform_3(%arg0: i32) -> (i32, i32) {
    %c0_i32 = arith.constant 0 : i32
    %c0_i32_0 = arith.constant 0 : i32
    return %arg0, %c0_i32 : i32, i32
  }
}

module attributes {stable_mosaic.version = 11 : i64} {
  func.func @_matmul_kernel(%arg0: i32, %arg1: i32, %arg2: i32, %arg3: memref<16x32xbf16, #tpu.memory_space<vmem>>, %arg4: memref<32x64xbf16, #tpu.memory_space<vmem>>, %arg5: memref<1x64xf32, #tpu.memory_space<vmem>>, %arg6: memref<16x64xbf16, #tpu.memory_space<vmem>>, %arg7: memref<16x64xf32, #tpu.memory_space<vmem>>) attributes {dimension_semantics = [#tpu.dimension_semantics<parallel>, #tpu.dimension_semantics<parallel>, #tpu.dimension_semantics<arbitrary>], iteration_bounds = array<i64: 1, 1, 1>, scalar_prefetch = 0 : i64, scratch_operands = 1 : i64, tpu.core_type = #tpu.core_type<tc>, window_params = [{transform_indices = @transform_0, window_bounds = array<i64: 16, 32>}, {transform_indices = @transform_1, window_bounds = array<i64: 32, 64>}, {transform_indices = @transform_2, window_bounds = array<i64: 1, 64>}, {transform_indices = @transform_3, window_bounds = array<i64: 16, 64>}]} {
    %c0_i32 = arith.constant 0 : i32
    %0 = arith.cmpi eq, %arg2, %c0_i32 : i32
    %1 = arith.extui %0 : i1 to i32
    %c0_i32_0 = arith.constant 0 : i32
    %2 = arith.cmpi ne, %1, %c0_i32_0 : i32
    scf.if %2 {
      %cst_10 = arith.constant 0.000000e+00 : f32
      %12 = vector.broadcast %cst_10 : f32 to vector<16x64xf32>
      %c0_11 = arith.constant 0 : index
      %c0_12 = arith.constant 0 : index
      %13 = vector.load %arg7[%c0_11, %c0_12] : memref<16x64xf32, #tpu.memory_space<vmem>>, vector<16x64xf32>
      tpu.vector_store %arg7[%c0_11, %c0_12], %12 {strides = array<i32>} : memref<16x64xf32, #tpu.memory_space<vmem>>, vector<16x64xf32>,
    } else {
    }
    %c0 = arith.constant 0 : index
    %c0_1 = arith.constant 0 : index
    %3 = vector.load %arg7[%c0, %c0_1] : memref<16x64xf32, #tpu.memory_space<vmem>>, vector<16x64xf32>
    %c0_2 = arith.constant 0 : index
    %c0_3 = arith.constant 0 : index
    %4 = vector.load %arg3[%c0_2, %c0_3] : memref<16x32xbf16, #tpu.memory_space<vmem>>, vector<16x32xbf16>
    %c0_4 = arith.constant 0 : index
    %c0_5 = arith.constant 0 : index
    %5 = vector.load %arg4[%c0_4, %c0_5] : memref<32x64xbf16, #tpu.memory_space<vmem>>, vector<32x64xbf16>
    %cst = arith.constant dense<0.000000e+00> : vector<16x64xf32>
    %6 = tpu.matmul %4, %5, %cst {dimension_numbers = #tpu.dot_dimension_numbers<[1], [0], [0], [1], [0, 0, 1, 1], [], []>} : vector<16x32xbf16>, vector<32x64xbf16>, vector<16x64xf32> -> vector<16x64xf32>
    %7 = arith.addf %3, %6 : vector<16x64xf32>
    %c0_6 = arith.constant 0 : index
    %c0_7 = arith.constant 0 : index
    %8 = vector.load %arg7[%c0_6, %c0_7] : memref<16x64xf32, #tpu.memory_space<vmem>>, vector<16x64xf32>
    tpu.vector_store %arg7[%c0_6, %c0_7], %7 {strides = array<i32>} : memref<16x64xf32, #tpu.memory_space<vmem>>, vector<16x64xf32>,
    %c0_i32_8 = arith.constant 0 : i32
    %9 = arith.cmpi eq, %arg2, %c0_i32_8 : i32
    %10 = arith.extui %9 : i1 to i32
    %c0_i32_9 = arith.constant 0 : i32
    %11 = arith.cmpi ne, %10, %c0_i32_9 : i32
    scf.if %11 {
      %c0_10 = arith.constant 0 : index
      %c0_11 = arith.constant 0 : index
      %12 = vector.load %arg7[%c0_10, %c0_11] : memref<16x64xf32, #tpu.memory_space<vmem>>, vector<16x64xf32>
      %c0_12 = arith.constant 0 : index
      %c0_13 = arith.constant 0 : index
      %13 = vector.load %arg5[%c0_12, %c0_13] : memref<1x64xf32, #tpu.memory_space<vmem>>, vector<1x64xf32>
      %14 = vector.broadcast %13 : vector<1x64xf32> to vector<16x64xf32>
      %15 = arith.addf %12, %14 : vector<16x64xf32>
      %16 = arith.truncf %15 : vector<16x64xf32> to vector<16x64xbf16>
      %c0_14 = arith.constant 0 : index
      %c0_15 = arith.constant 0 : index
      %17 = vector.load %arg6[%c0_14, %c0_15] : memref<16x64xbf16, #tpu.memory_space<vmem>>, vector<16x64xbf16>
      tpu.vector_store %arg6[%c0_14, %c0_15], %16 {strides = array<i32>} : memref<16x64xbf16, #tpu.memory_space<vmem>>, vector<16x64xbf16>,
    } else {
    }
    return
  }
  func.func @transform_0(%arg0: i32, %arg1: i32, %arg2: i32) -> (i32, i32) {
    %c0_i32 = arith.constant 0 : i32
    return %arg0, %arg2 : i32, i32
  }
  func.func @transform_1(%arg0: i32, %arg1: i32, %arg2: i32) -> (i32, i32) {
    %c0_i32 = arith.constant 0 : i32
    return %arg2, %arg1 : i32, i32
  }
  func.func @transform_2(%arg0: i32, %arg1: i32, %arg2: i32) -> (i32, i32) {
    %c0_i32 = arith.constant 0 : i32
    %c0_i32_0 = arith.constant 0 : i32
    return %c0_i32, %arg1 : i32, i32
  }
  func.func @transform_3(%arg0: i32, %arg1: i32, %arg2: i32) -> (i32, i32) {
    %c0_i32 = arith.constant 0 : i32
    return %arg0, %arg1 : i32, i32
  }
}

module attributes {stable_mosaic.version = 11 : i64} {
  func.func @_matmul_kernel(%arg0: i32, %arg1: i32, %arg2: i32, %arg3: memref<16x32xbf16, #tpu.memory_space<vmem>>, %arg4: memref<32x128xbf16, #tpu.memory_space<vmem>>, %arg5: memref<1x128xf32, #tpu.memory_space<vmem>>, %arg6: memref<16x128xf32, #tpu.memory_space<vmem>>, %arg7: memref<16x128xf32, #tpu.memory_space<vmem>>) attributes {dimension_semantics = [#tpu.dimension_semantics<parallel>, #tpu.dimension_semantics<parallel>, #tpu.dimension_semantics<arbitrary>], iteration_bounds = array<i64: 1, 1, 1>, scalar_prefetch = 0 : i64, scratch_operands = 1 : i64, tpu.core_type = #tpu.core_type<tc>, window_params = [{transform_indices = @transform_0, window_bounds = array<i64: 16, 32>}, {transform_indices = @transform_1, window_bounds = array<i64: 32, 128>}, {transform_indices = @transform_2, window_bounds = array<i64: 1, 128>}, {transform_indices = @transform_3, window_bounds = array<i64: 16, 128>}]} {
    %c0_i32 = arith.constant 0 : i32
    %0 = arith.cmpi eq, %arg2, %c0_i32 : i32
    %1 = arith.extui %0 : i1 to i32
    %c0_i32_0 = arith.constant 0 : i32
    %2 = arith.cmpi ne, %1, %c0_i32_0 : i32
    scf.if %2 {
      %cst_10 = arith.constant 0.000000e+00 : f32
      %12 = vector.broadcast %cst_10 : f32 to vector<16x128xf32>
      %c0_11 = arith.constant 0 : index
      %c0_12 = arith.constant 0 : index
      %13 = vector.load %arg7[%c0_11, %c0_12] : memref<16x128xf32, #tpu.memory_space<vmem>>, vector<16x128xf32>
      tpu.vector_store %arg7[%c0_11, %c0_12], %12 {strides = array<i32>} : memref<16x128xf32, #tpu.memory_space<vmem>>, vector<16x128xf32>,
    } else {
    }
    %c0 = arith.constant 0 : index
    %c0_1 = arith.constant 0 : index
    %3 = vector.load %arg7[%c0, %c0_1] : memref<16x128xf32, #tpu.memory_space<vmem>>, vector<16x128xf32>
    %c0_2 = arith.constant 0 : index
    %c0_3 = arith.constant 0 : index
    %4 = vector.load %arg3[%c0_2, %c0_3] : memref<16x32xbf16, #tpu.memory_space<vmem>>, vector<16x32xbf16>
    %c0_4 = arith.constant 0 : index
    %c0_5 = arith.constant 0 : index
    %5 = vector.load %arg4[%c0_4, %c0_5] : memref<32x128xbf16, #tpu.memory_space<vmem>>, vector<32x128xbf16>
    %cst = arith.constant dense<0.000000e+00> : vector<16x128xf32>
    %6 = tpu.matmul %4, %5, %cst {dimension_numbers = #tpu.dot_dimension_numbers<[1], [0], [0], [1], [0, 0, 1, 1], [], []>} : vector<16x32xbf16>, vector<32x128xbf16>, vector<16x128xf32> -> vector<16x128xf32>
    %7 = arith.addf %3, %6 : vector<16x128xf32>
    %c0_6 = arith.constant 0 : index
    %c0_7 = arith.constant 0 : index
    %8 = vector.load %arg7[%c0_6, %c0_7] : memref<16x128xf32, #tpu.memory_space<vmem>>, vector<16x128xf32>
    tpu.vector_store %arg7[%c0_6, %c0_7], %7 {strides = array<i32>} : memref<16x128xf32, #tpu.memory_space<vmem>>, vector<16x128xf32>,
    %c0_i32_8 = arith.constant 0 : i32
    %9 = arith.cmpi eq, %arg2, %c0_i32_8 : i32
    %10 = arith.extui %9 : i1 to i32
    %c0_i32_9 = arith.constant 0 : i32
    %11 = arith.cmpi ne, %10, %c0_i32_9 : i32
    scf.if %11 {
      %c0_10 = arith.constant 0 : index
      %c0_11 = arith.constant 0 : index
      %12 = vector.load %arg7[%c0_10, %c0_11] : memref<16x128xf32, #tpu.memory_space<vmem>>, vector<16x128xf32>
      %c0_12 = arith.constant 0 : index
      %c0_13 = arith.constant 0 : index
      %13 = vector.load %arg5[%c0_12, %c0_13] : memref<1x128xf32, #tpu.memory_space<vmem>>, vector<1x128xf32>
      %14 = vector.broadcast %13 : vector<1x128xf32> to vector<16x128xf32>
      %15 = arith.addf %12, %14 : vector<16x128xf32>
      %c0_14 = arith.constant 0 : index
      %c0_15 = arith.constant 0 : index
      %16 = vector.load %arg6[%c0_14, %c0_15] : memref<16x128xf32, #tpu.memory_space<vmem>>, vector<16x128xf32>
      tpu.vector_store %arg6[%c0_14, %c0_15], %15 {strides = array<i32>} : memref<16x128xf32, #tpu.memory_space<vmem>>, vector<16x128xf32>,
    } else {
    }
    return
  }
  func.func @transform_0(%arg0: i32, %arg1: i32, %arg2: i32) -> (i32, i32) {
    %c0_i32 = arith.constant 0 : i32
    return %arg0, %arg2 : i32, i32
  }
  func.func @transform_1(%arg0: i32, %arg1: i32, %arg2: i32) -> (i32, i32) {
    %c0_i32 = arith.constant 0 : i32
    return %arg2, %arg1 : i32, i32
  }
  func.func @transform_2(%arg0: i32, %arg1: i32, %arg2: i32) -> (i32, i32) {
    %c0_i32 = arith.constant 0 : i32
    %c0_i32_0 = arith.constant 0 : i32
    return %c0_i32, %arg1 : i32, i32
  }
  func.func @transform_3(%arg0: i32, %arg1: i32, %arg2: i32) -> (i32, i32) {
    %c0_i32 = arith.constant 0 : i32
    return %arg0, %arg1 : i32, i32
  }
}

</mosaic_0001>

<bundles_post_ra>
// kernel: transformer_forward.28
= control target key start
LH: loop header
LB: loop body
LE: loop exit
PB: predicated region body
PF: predicated region fallthrough
CT: control target
= control target key end

     0   :  { %vm19_vm0 = vcmask 785408   ;;  %v151_v0 = vmov 0.0   ;;  %vm152_vm1 = vmmov 0   ;;  %vm47_vm2 = vcmask 261120   ;;  %s195_s1 = inlined_call_operand.vmem [shape: bf16[32,96], index: 1, kind: input, shape index: {}]   ;;  %s196_s0 = inlined_call_operand.vmem [shape: bf16[16,32], index: 0, kind: input, shape index: {}]   ;;  %s197_s2 = inlined_call_operand.vmem [shape: f32[1,96], index: 2, kind: input, shape index: {}]   ;;  %s198_s3 = inlined_call_operand.vmem [shape: bf16[16,96], index: 3, kind: output, shape index: {}]  }
   0x1   :  { %138 = vmatprep.subr.bf16.mxu0 %v151_v0  ;;  %v148_v1 = vld [vmem:[%s195_s1] sm:$0xff]   ;;  %142 = vmatprep.mubr.msk.bf16.mxu0 %vm152_vm1, %v151_v0  ;;  %20 = vst.msk [vmem:[#allocation2] sm:$0xff] %vm19_vm0, %v151_v0  ;;  %21 = vst.msk [vmem:[#allocation2 + $0x8] sm:$0xff] %vm19_vm0, %v151_v0  ;;  %v149_v2 = vld [vmem:[%s195_s1 + $0x8] sm:$0xff]   ;;  %vm119_vm3 = vcmask 781312  }
   0x2   :  { %139 = vmatpush3.bf16.msra.mxu0 %v148_v1  ;;  %v150_v3 = vld [vmem:[%s196_s0] sm:$0xff]  }
   0x3   :  { %140 = vmatprep.subr.bf16.mxu0 %v151_v0  ;;  %v130_v12 = vld [vmem:[%s197_s2] ss:$0 sm:$0xff] }
   0x6   :  { %141 = vmatpush3.bf16.msra.mxu0 %v149_v2 }
   0x8   :  { %v22_v4 = vld [vmem:[#allocation2] sm:$0xff]  ;;  %v23_v6 = vld [vmem:[#allocation2 + $0x8] sm:$0xff] }
   0x9   :  { %143 = vmatmul.mubr.msk.bf16.vlgmr.msra.gmra.mrb[0].mxu0 %vm47_vm2, %v150_v3 }
  0xdc   :  { %v85_v5 = vpop.f32.mrb[0].mxu0 }
  0xdd   :  { %v92_v7 = vadd.f32 %v85_v5, %v22_v4  ;;  %v144_v8 = vpop.f32.mrb[1].mxu0 }
  0xde   :  { %v88_v9 = vpop.f32.mrb[2].mxu0 }
  0xdf   :  { %95 = vst.msk [vmem:[#allocation2] sm:$0xff] %vm19_vm0, %v92_v7  ;;  %v93_v10 = vadd.f32 %v88_v9, %v23_v6  ;;  %v145_v11 = vpop.f32.mrb[3].mxu0 }
  0xe1   :  { %96 = vst.msk [vmem:[#allocation2 + $0x8] sm:$0xff] %vm19_vm0, %v93_v10 }
  0xe6   :  { %v100_v13 = vld [vmem:[#allocation2] sm:$0xff] }
  0xe7   :  { %v109_v14 = vadd.f32 %v130_v12, %v100_v13 }
  0xe8   :  { %v101_v15 = vld [vmem:[#allocation2 + $0x8] sm:$0xff] }
  0xe9   :  { %v133_v16 = vpack.c.bf16 %v109_v14, %v109_v14  ;;  %v110_v17 = vadd.f32 %v130_v12, %v101_v15 }
  0xeb   :  { %120 = vst.msk [vmem:[%s198_s3] sm:$0xf] %vm119_vm3, %v133_v16  ;;  %v134_v18 = vpack.c.bf16 %v110_v17, %v110_v17 }
  0xed   :  { %121 = vst.msk [vmem:[%s198_s3 + $0x4] sm:$0xf] %vm119_vm3, %v134_v18 }

// kernel: transformer_forward.30
= control target key start
LH: loop header
LB: loop body
LE: loop exit
PB: predicated region body
PF: predicated region fallthrough
CT: control target
= control target key end

     0   :  { %vm19_vm0 = vcmask 261120   ;;  %v150_v0 = vmov 0.0   ;;  %vm151_vm1 = vmmov 0   ;;  %vm118_vm2 = vcmask 257024   ;;  %s195_s1 = inlined_call_operand.vmem [shape: bf16[32,32], index: 1, kind: input, shape index: {}]   ;;  %s196_s0 = inlined_call_operand.vmem [shape: bf16[16,32], index: 0, kind: input, shape index: {}]   ;;  %s197_s2 = inlined_call_operand.vmem [shape: f32[1,32], index: 2, kind: input, shape index: {}]   ;;  %s198_s3 = inlined_call_operand.vmem [shape: bf16[16,32], index: 3, kind: output, shape index: {}]  }
   0x1   :  { %137 = vmatprep.subr.bf16.mxu0 %v150_v0  ;;  %v147_v1 = vld [vmem:[%s195_s1] sm:$0xff]   ;;  %141 = vmatprep.mubr.msk.bf16.mxu0 %vm151_vm1, %v150_v0  ;;  %20 = vst.msk [vmem:[#allocation2] sm:$0xff] %vm19_vm0, %v150_v0  ;;  %21 = vst.msk [vmem:[#allocation2 + $0x8] sm:$0xff] %vm19_vm0, %v150_v0  ;;  %v148_v2 = vld [vmem:[%s195_s1 + $0x8] sm:$0xff]  }
   0x2   :  { %138 = vmatpush3.bf16.msra.mxu0 %v147_v1  ;;  %v149_v3 = vld [vmem:[%s196_s0] sm:$0xff]  }
   0x3   :  { %139 = vmatprep.subr.bf16.mxu0 %v150_v0  ;;  %v129_v12 = vld [vmem:[%s197_s2] ss:$0 sm:$0xff] }
   0x6   :  { %140 = vmatpush3.bf16.msra.mxu0 %v148_v2 }
   0x8   :  { %v22_v4 = vld [vmem:[#allocation2] sm:$0xff]  ;;  %v23_v6 = vld [vmem:[#allocation2 + $0x8] sm:$0xff] }
   0x9   :  { %142 = vmatmul.mubr.msk.bf16.vlgmr.msra.gmra.mrb[0].mxu0 %vm19_vm0, %v149_v3 }
  0xdc   :  { %v85_v5 = vpop.f32.mrb[0].mxu0 }
  0xdd   :  { %v92_v7 = vadd.f32 %v85_v5, %v22_v4  ;;  %v143_v8 = vpop.f32.mrb[1].mxu0 }
  0xde   :  { %v88_v9 = vpop.f32.mrb[2].mxu0 }
  0xdf   :  { %94 = vst.msk [vmem:[#allocation2] sm:$0xff] %vm19_vm0, %v92_v7  ;;  %v93_v10 = vadd.f32 %v88_v9, %v23_v6  ;;  %v144_v11 = vpop.f32.mrb[3].mxu0 }
  0xe1   :  { %95 = vst.msk [vmem:[#allocation2 + $0x8] sm:$0xff] %vm19_vm0, %v93_v10 }
  0xe6   :  { %v99_v13 = vld [vmem:[#allocation2] sm:$0xff] }
  0xe7   :  { %v108_v14 = vadd.f32 %v129_v12, %v99_v13 }
  0xe8   :  { %v100_v15 = vld [vmem:[#allocation2 + $0x8] sm:$0xff] }
  0xe9   :  { %v132_v16 = vpack.c.bf16 %v108_v14, %v108_v14  ;;  %v109_v17 = vadd.f32 %v129_v12, %v100_v15 }
  0xeb   :  { %119 = vst.msk [vmem:[%s198_s3] sm:$0xf] %vm118_vm2, %v132_v16  ;;  %v133_v18 = vpack.c.bf16 %v109_v17, %v109_v17 }
  0xed   :  { %120 = vst.msk [vmem:[%s198_s3 + $0x4] sm:$0xf] %vm118_vm2, %v133_v18 }

// kernel: transformer_forward.29
= control target key start
LH: loop header
LB: loop body
LE: loop exit
PB: predicated region body
PF: predicated region fallthrough
CT: control target
= control target key end

     0   :  { %s1012_s27 = smov 0   ;;  %s1014_s28 = smov 0   ;;  %s1130_s0 = inlined_call_operand.vmem [shape: bf16[2,4,8,8], index: 0, kind: input, shape index: {}]   ;;  %s1131_s1 = inlined_call_operand.vmem [shape: bf16[2,4,8,8], index: 1, kind: input, shape index: {}]   ;;  %s1132_s2 = inlined_call_operand.vmem [shape: bf16[2,4,8,8], index: 2, kind: input, shape index: {}]   ;;  %s1133_s3 = inlined_call_operand.vmem [shape: bf16[2,8,32], index: 3, kind: input, shape index: {}]   ;;  %s1134_s4 = inlined_call_operand.vmem [shape: bf16[4,8,32], index: 4, kind: input, shape index: {}]   ;;  %s1135_s5 = inlined_call_operand.vmem [shape: f32[1,32], index: 5, kind: input, shape index: {}]   ;;  %s1136_s6 = inlined_call_operand.vmem [shape: f32[1,32], index: 6, kind: input, shape index: {}]   ;;  %s1137_s7 = inlined_call_operand.vmem [shape: f32[1,32], index: 7, kind: input, shape index: {}]   ;;  %s1138_s8 = inlined_call_operand.vmem [shape: bf16[2,8,32], index: 8, kind: output, shape index: {}]  }
   0x1   :  { %s1016_s29 = smov 0   ;;  %s1018_s30 = smov 0  }
   0x2   :  { %s1020_s9 = smov 0  }
   0x3 LB: > { %s30_s10 = sadd.s32 1, %s954_s29  ;;  %s37_s11 = sadd.s32 1, %s958_s30  ;;  %s962_s9 = sphi %s1020_s9, %s18_s9   ;;  %s958_s30 = sphi %s1018_s30, %s1147_s30   ;;  %s954_s29 = sphi %s1016_s29, %s1146_s29   ;;  %s950_s28 = sphi %s1014_s28, %s1145_s28   ;;  %s946_s27 = sphi %s1012_s27, %s1144_s27  }
   0x4   : > { %p31_p0 = scmp.ge.s32.totalorder %s30_s10, 4  ;;  %p831_p1 = scmp.ge.s32.totalorder %s962_s9, 1 }
   0x5   : > { %p346_p2 = scmp.lt.s32.totalorder %s962_s9, 9 }
   0x6   : > { %s1149_s10 = smov (%p31_p0, %s30_s10), 0  ;;  %s1151_s11 = smov (!%p31_p0, %s37_s11), %s958_s30 }
   0x7   : > { %1139 = sst [smem:[#allocation3_spill]] %s1149_s10  ;;  %p347_p3 = pnand %p831_p1, %p346_p2 }
   0x8   : > { %p39_p4 = scmp.ge.s32.totalorder %s1151_s11, 2  ;;  %p415_p5 = scmp.lt.s32.totalorder (!%p347_p3), %s950_s28, 1 }
   0x9   : > { %350 = sbr.rel (%p347_p3) target bundleno = 1318 (0x526), region = 52  ;;  %p417_p6 = scmp.lt.s32.totalorder (!%p347_p3), %s946_s27, 3 }
   0xa   : > { %s1153_s11 = smov (%p39_p4, %s1151_s11), 0  ;;  %p841_p7 = scmp.ne.s32.totalorder (!%p347_p3), %s946_s27, 0 }
   0xb   : > { %1140 = sst [smem:[#allocation4_spill]] %s1153_s11 }
  0x10   : > { %s1155_s28 = smov (!%p415_p5, %s950_s28), 1  ;;  %464 = sbr.rel (%p841_p7) target bundleno = 23 (0x17), region = 56 }
  0x11   : > { %s418_s12 = scalar_select %p417_p6, %s946_s27, 3 }
  0x12   : > { %s1046_s13 = sshll.u32 %s1155_s28, 2  ;;  %vm465_vm0 = vcmask (!%p841_p7), 261120   ;;  %v964_v0 = vmov (!%p841_p7), 0.0  }
  0x13   : > { %s423_s14 = sadd.s32 %s1046_s13, %s418_s12  ;;  %s839_s19 = sshll.u32 %s418_s12, 2  ;;  %466 = vst.msk [vmem:[#allocation2] sm:$0xff] (!%p841_p7), %vm465_vm0, %v964_v0 }
  0x14   : > { %s1053_s18 = sshll.u32 %s423_s14, 2  ;;  %s1070_s14 = scalar_lea.vmem %s1134_s4, %s839_s19 }
  0x15   : > { %s425_s22 = scalar_lea.vmem %s1130_s0, %s1053_s18  ;;  %s433_s25 = scalar_lea.vmem %s1131_s1, %s1053_s18 }
  0x16   : > { %s441_s11 = scalar_lea.vmem %s1132_s2, %s1053_s18  ;;  %s459_s12 = scalar_lea.vmem %s1138_s8, %s1046_s13 }
  0x17 PF: > { %v468_v1 = vld [vmem:[%s433_s25] sm:$0xf]  ;;  %vm470_vm1 = vcmask 64512   ;;  %v965_v2 = vmov 0.0   ;;  %vm966_vm2 = vmmov 0   ;;  %vm533_vm3 = vcmask 1043456  }
  0x18   : > { %857 = vmatprep.subr.bf16.mxu0 %v965_v2  ;;  %v475_v3 = vsel %vm470_vm1, %v468_v1, 0  ;;  %859 = vmatprep.mubr.msk.bf16.mxu0 %vm966_vm2, %v965_v2  ;;  %v467_v4 = vld [vmem:[%s425_s22] sm:$0xf]  ;;  %vm627_vm4 = vcmask 261120   ;;  %p845_p8 = scmp.ne.s32.totalorder %s946_s27, 3 }
  0x19   : > { %858 = vmatpush3.bf16.xpose.msra.mxu0 %v475_v3  ;;  %863 = vmatprep.subr.bf16.mxu1 %v965_v2  ;;  %v469_v16 = vld [vmem:[%s441_s11] sm:$0xf]  ;;  %s1141_s21 = scalar_lea.vmem (!%p845_p8), %s1133_s3, %s1046_s13  ;;  %vm676_vm5 = vcmask (!%p845_p8), 257024  }
  0x1a   : > { %865 = vmatprep.mubr.msk.bf16.mxu1 %vm966_vm2, %v965_v2  ;;  %v535_v17 = vsel %vm533_vm3, %v469_v16, 0  ;;  %v579_v20 = vld [vmem:[%s1070_s14] sm:$0xf] }
  0x1b   : > { %864 = vmatpush3.bf16.msra.mxu1 %v535_v17  ;;  %v584_v22 = vsel %vm533_vm3, %v579_v20, 0  ;;  %v577_v29 = vld [vmem:[#allocation2] sm:$0xff] }
  0x1c   : > { %869 = vmatprep.subr.bf16.mxu1 %v965_v2  ;;  %v846_v36 = vld [vmem:[%s1135_s5] ss:$0 sm:$0xff] (!%p845_p8) }
  0x1d   : > { %v642_v37 = vld [vmem:[%s1141_s21] sm:$0xf] (!%p845_p8) }
  0x1e   : > { %v643_v39 = vunpack.c.l.bf16 (!%p845_p8), %v642_v37  ;;  %v847_v51 = vld [vmem:[%s1136_s6] ss:$0 sm:$0xff] (!%p845_p8) }
  0x1f   : > { %v848_v53 = vld [vmem:[%s1137_s7] ss:$0 sm:$0xff] (!%p845_p8) }
  0x20   : > { %860 = vmatmul.mubr.msk.bf16.vlgmr.msra.gmra.mrb[0].mxu0 %vm470_vm1, %v467_v4 }
  0xf3   : > { %v511_v5 = vpop.f32.mrb[0].mxu0 }
  0xf4   : > { %v517_v6 = vmul.f32 0.35355338, %v511_v5  ;;  %v861_v7 = vpop.f32.mrb[1].mxu0 }
  0xf5   : > { %v514_v8 = vpop.f32.mrb[2].mxu0 }
  0xf6   : > { %v862_v9 = vpop.f32.mrb[3].mxu0  ;;  %v518_v10 = vsel %vm470_vm1, %v517_v6, -inf }
  0xf7   : > { %519 = vmax.xlane.f32.xlu0 %v518_v10 }
 0x184   : > { %v520_v11 = vpop.xlane.xlu0 %519 }
 0x185   : > { %v521_v12 = vsub.f32 %v517_v6, %v520_v11 }
 0x187   : > { %v522_v13 = vmul.f32 1.442695, %v521_v12 }
 0x189   : > { %918 = vpow2.f32 %v522_v13 }
 0x193   : > { %v919_v14 = vpop.eup %918 }
 0x194   : > { %v524_v15 = vsel %vm470_vm1, %v919_v14, 0.0 }
 0x195   : > { %525 = vadd.xlane.f32.xlu0 %v524_v15 }
 0x222   : > { %v526_v18 = vpop.xlane.xlu0 %525 }
 0x223   : > { %920 = vrcp.f32 %v526_v18 }
 0x22d   : > { %v921_v19 = vpop.eup %920 }
 0x22e   : > { %v528_v21 = vmul.f32 %v921_v19, %v919_v14 }
 0x230   : > { %v529_v23 = vpack.c.bf16 %v528_v21, %v528_v21 }
 0x232   : > { %866 = vmatmul.mubr.msk.bf16.vlgmr.msra.gmra.mrb[0].mxu1 %vm470_vm1, %v529_v23 }
 0x233   : > { %870 = vmatpush3.bf16.msra.mxu1 %v584_v22  ;;  %871 = vmatprep.mubr.msk.bf16.mxu1 %vm966_vm2, %v965_v2 }
 0x305   : > { %v571_v24 = vpop.f32.mrb[0].mxu1 }
 0x306   : > { %v578_v25 = vpack.c.bf16 %v571_v24, %v571_v24  ;;  %v867_v26 = vpop.f32.mrb[1].mxu1 }
 0x307   : > { %v574_v27 = vpop.f32.mrb[2].mxu1 }
 0x308   : > { %v868_v28 = vpop.f32.mrb[3].mxu1  ;;  %872 = vmatmul.mubr.msk.bf16.vlgmr.msra.gmra.mrb[4].mxu1 %vm470_vm1, %v578_v25 }
 0x3d8   : > { %632 = sbr.rel (%p845_p8) target bundleno = 1318 (0x526), region = 60 }
 0x3db   : > { %v620_v30 = vpop.f32.mrb[4].mxu1 }
 0x3dc   : > { %v626_v31 = vadd.f32 %v620_v30, %v577_v29  ;;  %v873_v32 = vpop.f32.mrb[5].mxu1 }
 0x3dd   : > { %v623_v33 = vpop.f32.mrb[6].mxu1 }
 0x3de   : > { %628 = vst.msk [vmem:[#allocation2] sm:$0xff] %vm627_vm4, %v626_v31  ;;  %v874_v34 = vpop.f32.mrb[7].mxu1 }
 0x3e5   : > { %v633_v35 = vld [vmem:[#allocation2] sm:$0xff] }
 0x3e6   : > { %v641_v38 = vadd.f32 %v846_v36, %v633_v35 }
 0x3e8   : > { %v644_v40 = vadd.f32 %v643_v39, %v641_v38 }
 0x3ea   : > { %v647_v41 = vsel %vm627_vm4, %v644_v40, 0.0 }
 0x3eb   : > { %648 = vadd.xlane.f32.xlu0 %v647_v41 }
 0x478   : > { %v649_v42 = vpop.xlane.xlu0 %648 }
 0x479   : > { %v651_v43 = vmul.f32 0.03125, %v649_v42 }
 0x47b   : > { %v652_v44 = vsub.f32 %v644_v40, %v651_v43 }
 0x47d   : > { %v653_v45 = vmul.f32 %v652_v44, %v652_v44 }
 0x47f   : > { %v654_v46 = vsel %vm627_vm4, %v653_v45, 0.0 }
 0x480   : > { %655 = vadd.xlane.f32.xlu0 %v654_v46 }
 0x50d   : > { %v656_v47 = vpop.xlane.xlu0 %655 }
 0x50e   : > { %v657_v48 = vmul.f32 0.03125, %v656_v47 }
 0x510   : > { %v658_v49 = vadd.f32 1e-05, %v657_v48 }
 0x512   : > { %922 = vrsqrt.f32 %v658_v49 }
 0x51c   : > { %v923_v50 = vpop.eup %922 }
 0x51d   : > { %v660_v52 = vmul.f32 %v923_v50, %v652_v44 }
 0x51f   : > { %v667_v54 = vmul.f32 %v847_v51, %v660_v52 }
 0x521   : > { %v674_v55 = vadd.f32 %v848_v53, %v667_v54 }
 0x523   : > { %v675_v56 = vpack.c.bf16 %v674_v55, %v674_v55 }
 0x525   : > { %677 = vst.msk [vmem:[%s459_s12] sm:$0xf] %vm676_vm5, %v675_v56 }
 0x526 PF: > { %s18_s9 = sadd.s32 1, %s962_s9   ;;  %s1142_s15 = sld [smem:[#allocation3_spill]] }
 0x527   : > { %p15_p9 = scmp.ge.s32.totalorder %s18_s9, 10   ;;  %s1143_s16 = sld [smem:[#allocation4_spill]] }
 0x528   : > { %s1144_s27 = smov %s954_s29  ;;  %s1145_s28 = smov %s958_s30 }
 0x529   :  { %17 = sbr.rel (!%p15_p9) target bundleno = 3 (0x3), region = 102 }
 0x52c   : > { %s1146_s29 = smov %s1142_s15 }
 0x52d   : > { %s1147_s30 = smov %s1143_s16 }

// kernel: transformer_forward.23
= control target key start
LH: loop header
LB: loop body
LE: loop exit
PB: predicated region body
PF: predicated region fallthrough
CT: control target
= control target key end

     0   :  { %v312_v0 = vmov 0.0   ;;  %vm313_vm0 = vmmov 0   ;;  %vm57_vm1 = vcmask 261120   ;;  %vm144_vm2 = vcmask 523264   ;;  %s398_s1 = inlined_call_operand.vmem [shape: bf16[32,64], index: 1, kind: input, shape index: {}]   ;;  %s399_s0 = inlined_call_operand.vmem [shape: bf16[16,32], index: 0, kind: input, shape index: {}]   ;;  %s400_s3 = inlined_call_operand.vmem [shape: bf16[64,32], index: 3, kind: input, shape index: {}]   ;;  %s401_s2 = inlined_call_operand.vmem [shape: f32[1,64], index: 2, kind: input, shape index: {}]   ;;  %s402_s4 = inlined_call_operand.vmem [shape: f32[1,32], index: 4, kind: input, shape index: {}]   ;;  %s403_s5 = inlined_call_operand.vmem [shape: f32[1,32], index: 5, kind: input, shape index: {}]   ;;  %s404_s6 = inlined_call_operand.vmem [shape: f32[1,32], index: 6, kind: input, shape index: {}]   ;;  %s405_s7 = inlined_call_operand.vmem [shape: bf16[16,32], index: 7, kind: output, shape index: {}]  }
   0x1   :  { %278 = vmatprep.subr.bf16.mxu0 %v312_v0  ;;  %v300_v1 = vld [vmem:[%s398_s1] sm:$0xff]   ;;  %282 = vmatprep.mubr.msk.bf16.mxu0 %vm313_vm0, %v312_v0  ;;  %v301_v2 = vld [vmem:[%s398_s1 + $0x8] sm:$0xff]   ;;  %v305_v6 = vld [vmem:[%s400_s3 + $0x10] sm:$0xff]   ;;  %vm246_vm3 = vcmask 257024  }
   0x2   :  { %286 = vmatprep.subr.bf16.mxu1 %v312_v0  ;;  %294 = vmatprep.mubr.msk.bf16.mxu1 %vm313_vm0, %v312_v0  ;;  %v27_v3 = vld [vmem:[%s399_s0] sm:$0xff]   ;;  %v304_v5 = vld [vmem:[%s400_s3 + $0x8] sm:$0xff]   ;;  %v306_v7 = vld [vmem:[%s400_s3 + $0x18] sm:$0xff]  }
   0x3   :  { %279 = vmatpush3.bf16.msra.mxu0 %v300_v1  ;;  %v303_v4 = vld [vmem:[%s400_s3] sm:$0xff]   ;;  %v189_v19 = vunpack.c.l.bf16 %v27_v3  ;;  %v190_v23 = vunpack.c.h.bf16 %v27_v3 }
   0x4   :  { %280 = vmatprep.subr.bf16.mxu0 %v312_v0  ;;  %287 = vmatpush3.bf16.msra.mxu1 %v303_v4  ;;  %v253_v8 = vld [vmem:[%s401_s2] ss:$0 sm:$0xff] }
   0x5   :  { %288 = vmatprep.subr.bf16.mxu1 %v312_v0  ;;  %v258_v18 = vld [vmem:[%s402_s4] ss:$0 sm:$0xff] }
   0x6   :  { %v264_v48 = vld [vmem:[%s403_s5] ss:$0 sm:$0xff] }
   0x7   :  { %281 = vmatpush3.bf16.msra.mxu0 %v301_v2  ;;  %v265_v50 = vld [vmem:[%s404_s6] ss:$0 sm:$0xff] }
   0x8   :  { %289 = vmatpush3.bf16.msra.mxu1 %v304_v5 }
   0x9   :  { %290 = vmatprep.subr.bf16.mxu1 %v312_v0 }
   0xa   :  { %283 = vmatmul.mubr.msk.bf16.vlgmr.msra.gmra.mrb[0].mxu0 %vm57_vm1, %v27_v3 }
   0xc   :  { %291 = vmatpush3.bf16.msra.mxu1 %v305_v6 }
   0xd   :  { %292 = vmatprep.subr.bf16.mxu1 %v312_v0 }
  0x10   :  { %293 = vmatpush3.bf16.msra.mxu1 %v306_v7 }
  0xdd   :  { %v95_v9 = vpop.f32.mrb[0].mxu0 }
  0xde   :  { %v96_v10 = vadd.f32 %v253_v8, %v95_v9  ;;  %v284_v11 = vpop.f32.mrb[1].mxu0 }
  0xdf   :  { %v98_v12 = vpop.f32.mrb[2].mxu0 }
  0xe0   :  { %v99_v13 = vadd.f32 %v253_v8, %v98_v12  ;;  %v285_v14 = vpop.f32.mrb[3].mxu0  ;;  %v102_v15 = vmax.f32 %v96_v10, 0.0 }
  0xe2   :  { %v103_v16 = vmax.f32 %v99_v13, 0.0 }
  0xe4   :  { %v104_v17 = vpack.c.bf16 %v103_v16, %v102_v15 }
  0xe6   :  { %295 = vmatmul.mubr.msk.bf16.vlgmr.msra.gmra.mrb[0].mxu1 %vm144_vm2, %v104_v17 }
 0x1b9   :  { %v182_v20 = vpop.f32.mrb[0].mxu1 }
 0x1ba   :  { %v183_v21 = vadd.f32 %v258_v18, %v182_v20  ;;  %v296_v22 = vpop.f32.mrb[1].mxu1 }
 0x1bb   :  { %v185_v24 = vpop.f32.mrb[2].mxu1 }
 0x1bc   :  { %v186_v25 = vadd.f32 %v258_v18, %v185_v24  ;;  %v297_v26 = vpop.f32.mrb[3].mxu1  ;;  %v191_v27 = vadd.f32 %v189_v19, %v183_v21 }
 0x1be   :  { %v195_v28 = vsel %vm57_vm1, %v191_v27, 0.0  ;;  %v192_v29 = vadd.f32 %v190_v23, %v186_v25 }
 0x1bf   :  { %196 = vadd.xlane.f32.xlu0 %v195_v28 }
 0x1c0   :  { %v198_v30 = vsel %vm57_vm1, %v192_v29, 0.0 }
 0x1c3   :  { %199 = vadd.xlane.f32.xlu0 %v198_v30 }
 0x24c   :  { %v197_v31 = vpop.xlane.xlu0 %196 }
 0x24d   :  { %v202_v32 = vmul.f32 0.03125, %v197_v31 }
 0x24f   :  { %v204_v33 = vsub.f32 %v191_v27, %v202_v32 }
 0x250   :  { %v200_v34 = vpop.xlane.xlu0 %199 }
 0x251   :  { %v203_v35 = vmul.f32 0.03125, %v200_v34  ;;  %v206_v36 = vmul.f32 %v204_v33, %v204_v33 }
 0x253   :  { %v205_v37 = vsub.f32 %v192_v29, %v203_v35  ;;  %v208_v38 = vsel %vm57_vm1, %v206_v36, 0.0 }
 0x254   :  { %209 = vadd.xlane.f32.xlu1 %v208_v38 }
 0x255   :  { %v207_v39 = vmul.f32 %v205_v37, %v205_v37 }
 0x257   :  { %v211_v40 = vsel %vm57_vm1, %v207_v39, 0.0 }
 0x258   :  { %212 = vadd.xlane.f32.xlu1 %v211_v40 }
 0x2e1   :  { %v210_v41 = vpop.xlane.xlu1 %209 }
 0x2e2   :  { %v214_v42 = vmul.f32 0.03125, %v210_v41 }
 0x2e4   :  { %v216_v43 = vadd.f32 1e-05, %v214_v42 }
 0x2e5   :  { %v213_v44 = vpop.xlane.xlu1 %212 }
 0x2e6   :  { %308 = vrsqrt.f32 %v216_v43  ;;  %v215_v45 = vmul.f32 0.03125, %v213_v44 }
 0x2e8   :  { %v217_v46 = vadd.f32 1e-05, %v215_v45 }
 0x2ea   :  { %310 = vrsqrt.f32 %v217_v46 }
 0x2f0   :  { %v309_v47 = vpop.eup %308 }
 0x2f1   :  { %v220_v49 = vmul.f32 %v309_v47, %v204_v33 }
 0x2f3   :  { %v228_v51 = vmul.f32 %v264_v48, %v220_v49 }
 0x2f4   :  { %v311_v52 = vpop.eup %310 }
 0x2f5   :  { %v236_v53 = vadd.f32 %v265_v50, %v228_v51  ;;  %v221_v54 = vmul.f32 %v311_v52, %v205_v37 }
 0x2f7   :  { %v268_v55 = vpack.c.bf16 %v236_v53, %v236_v53  ;;  %v229_v56 = vmul.f32 %v264_v48, %v221_v54 }
 0x2f9   :  { %247 = vst.msk [vmem:[%s405_s7] sm:$0xf] %vm246_vm3, %v268_v55  ;;  %v237_v57 = vadd.f32 %v265_v50, %v229_v56 }
 0x2fb   :  { %v269_v58 = vpack.c.bf16 %v237_v57, %v237_v57 }
 0x2fd   :  { %248 = vst.msk [vmem:[%s405_s7 + $0x4] sm:$0xf] %vm246_vm3, %v269_v58 }

// kernel: transformer_forward.27
= control target key start
LH: loop header
LB: loop body
LE: loop exit
PB: predicated region body
PF: predicated region fallthrough
CT: control target
= control target key end

     0   :  { %vm20_vm0 = vcmask 261120   ;;  %vm72_vm1 = vcmask 257024   ;;  %s132_s0 = inlined_call_operand.vmem [shape: bf16[16,32], index: 0, kind: input, shape index: {}]   ;;  %s133_s1 = inlined_call_operand.vmem [shape: f32[1,32], index: 1, kind: input, shape index: {}]   ;;  %s134_s2 = inlined_call_operand.vmem [shape: f32[1,32], index: 2, kind: input, shape index: {}]   ;;  %s135_s3 = inlined_call_operand.vmem [shape: bf16[16,32], index: 3, kind: output, shape index: {}]  }
   0x1   :  { %v86_v0 = vld [vmem:[%s132_s0] sm:$0xff]  }
   0x2   :  { %v87_v1 = vunpack.c.l.bf16 %v86_v0  ;;  %v88_v2 = vunpack.c.h.bf16 %v86_v0  ;;  %v79_v22 = vld [vmem:[%s133_s1] ss:$0 sm:$0xff] }
   0x3   :  { %v80_v24 = vld [vmem:[%s134_s2] ss:$0 sm:$0xff] }
   0x4   :  { %v21_v3 = vsel %vm20_vm0, %v87_v1, 0.0  ;;  %v24_v4 = vsel %vm20_vm0, %v88_v2, 0.0 }
   0x5   :  { %22 = vadd.xlane.f32.xlu0 %v21_v3 }
   0x9   :  { %25 = vadd.xlane.f32.xlu0 %v24_v4 }
  0x92   :  { %v23_v5 = vpop.xlane.xlu0 %22 }
  0x93   :  { %v28_v6 = vmul.f32 0.03125, %v23_v5 }
  0x95   :  { %v30_v7 = vsub.f32 %v87_v1, %v28_v6 }
  0x96   :  { %v26_v8 = vpop.xlane.xlu0 %25 }
  0x97   :  { %v29_v9 = vmul.f32 0.03125, %v26_v8  ;;  %v32_v10 = vmul.f32 %v30_v7, %v30_v7 }
  0x99   :  { %v31_v11 = vsub.f32 %v88_v2, %v29_v9  ;;  %v34_v12 = vsel %vm20_vm0, %v32_v10, 0.0 }
  0x9a   :  { %35 = vadd.xlane.f32.xlu1 %v34_v12 }
  0x9b   :  { %v33_v13 = vmul.f32 %v31_v11, %v31_v11 }
  0x9d   :  { %v37_v14 = vsel %vm20_vm0, %v33_v13, 0.0 }
  0x9e   :  { %38 = vadd.xlane.f32.xlu1 %v37_v14 }
 0x127   :  { %v36_v15 = vpop.xlane.xlu1 %35 }
 0x128   :  { %v40_v16 = vmul.f32 0.03125, %v36_v15 }
 0x12a   :  { %v42_v17 = vadd.f32 1e-05, %v40_v16 }
 0x12b   :  { %v39_v18 = vpop.xlane.xlu1 %38 }
 0x12c   :  { %89 = vrsqrt.f32 %v42_v17  ;;  %v41_v19 = vmul.f32 0.03125, %v39_v18 }
 0x12e   :  { %v43_v20 = vadd.f32 1e-05, %v41_v19 }
 0x130   :  { %91 = vrsqrt.f32 %v43_v20 }
 0x136   :  { %v90_v21 = vpop.eup %89 }
 0x137   :  { %v46_v23 = vmul.f32 %v90_v21, %v30_v7 }
 0x139   :  { %v54_v25 = vmul.f32 %v79_v22, %v46_v23 }
 0x13a   :  { %v92_v26 = vpop.eup %91 }
 0x13b   :  { %v62_v27 = vadd.f32 %v80_v24, %v54_v25  ;;  %v47_v28 = vmul.f32 %v92_v26, %v31_v11 }
 0x13d   :  { %v83_v29 = vpack.c.bf16 %v62_v27, %v62_v27  ;;  %v55_v30 = vmul.f32 %v79_v22, %v47_v28 }
 0x13f   :  { %73 = vst.msk [vmem:[%s135_s3] sm:$0xf] %vm72_vm1, %v83_v29  ;;  %v63_v31 = vadd.f32 %v80_v24, %v55_v30 }
 0x141   :  { %v84_v32 = vpack.c.bf16 %v63_v31, %v63_v31 }
 0x143   :  { %74 = vst.msk [vmem:[%s135_s3 + $0x4] sm:$0xf] %vm72_vm1, %v84_v32 }

// kernel: transformer_forward.31
= control target key start
LH: loop header
LB: loop body
LE: loop exit
PB: predicated region body
PF: predicated region fallthrough
CT: control target
= control target key end

     0   :  { %vm19_vm0 = vcmask 523264   ;;  %v151_v0 = vmov 0.0   ;;  %vm152_vm1 = vmmov 0   ;;  %vm47_vm2 = vcmask 261120   ;;  %s195_s1 = inlined_call_operand.vmem [shape: bf16[32,64], index: 1, kind: input, shape index: {}]   ;;  %s196_s0 = inlined_call_operand.vmem [shape: bf16[16,32], index: 0, kind: input, shape index: {}]   ;;  %s197_s2 = inlined_call_operand.vmem [shape: f32[1,64], index: 2, kind: input, shape index: {}]   ;;  %s198_s3 = inlined_call_operand.vmem [shape: bf16[16,64], index: 3, kind: output, shape index: {}]  }
   0x1   :  { %138 = vmatprep.subr.bf16.mxu0 %v151_v0  ;;  %v148_v1 = vld [vmem:[%s195_s1] sm:$0xff]   ;;  %142 = vmatprep.mubr.msk.bf16.mxu0 %vm152_vm1, %v151_v0  ;;  %20 = vst.msk [vmem:[#allocation2] sm:$0xff] %vm19_vm0, %v151_v0  ;;  %21 = vst.msk [vmem:[#allocation2 + $0x8] sm:$0xff] %vm19_vm0, %v151_v0  ;;  %v149_v2 = vld [vmem:[%s195_s1 + $0x8] sm:$0xff]   ;;  %vm119_vm3 = vcmask 519168  }
   0x2   :  { %139 = vmatpush3.bf16.msra.mxu0 %v148_v1  ;;  %v150_v3 = vld [vmem:[%s196_s0] sm:$0xff]  }
   0x3   :  { %140 = vmatprep.subr.bf16.mxu0 %v151_v0  ;;  %v130_v12 = vld [vmem:[%s197_s2] ss:$0 sm:$0xff] }
   0x6   :  { %141 = vmatpush3.bf16.msra.mxu0 %v149_v2 }
   0x8   :  { %v22_v4 = vld [vmem:[#allocation2] sm:$0xff]  ;;  %v23_v6 = vld [vmem:[#allocation2 + $0x8] sm:$0xff] }
   0x9   :  { %143 = vmatmul.mubr.msk.bf16.vlgmr.msra.gmra.mrb[0].mxu0 %vm47_vm2, %v150_v3 }
  0xdc   :  { %v85_v5 = vpop.f32.mrb[0].mxu0 }
  0xdd   :  { %v92_v7 = vadd.f32 %v85_v5, %v22_v4  ;;  %v144_v8 = vpop.f32.mrb[1].mxu0 }
  0xde   :  { %v88_v9 = vpop.f32.mrb[2].mxu0 }
  0xdf   :  { %95 = vst.msk [vmem:[#allocation2] sm:$0xff] %vm19_vm0, %v92_v7  ;;  %v93_v10 = vadd.f32 %v88_v9, %v23_v6  ;;  %v145_v11 = vpop.f32.mrb[3].mxu0 }
  0xe1   :  { %96 = vst.msk [vmem:[#allocation2 + $0x8] sm:$0xff] %vm19_vm0, %v93_v10 }
  0xe6   :  { %v100_v13 = vld [vmem:[#allocation2] sm:$0xff] }
  0xe7   :  { %v109_v14 = vadd.f32 %v130_v12, %v100_v13 }
  0xe8   :  { %v101_v15 = vld [vmem:[#allocation2 + $0x8] sm:$0xff] }
  0xe9   :  { %v133_v16 = vpack.c.bf16 %v109_v14, %v109_v14  ;;  %v110_v17 = vadd.f32 %v130_v12, %v101_v15 }
  0xeb   :  { %120 = vst.msk [vmem:[%s198_s3] sm:$0xf] %vm119_vm3, %v133_v16  ;;  %v134_v18 = vpack.c.bf16 %v110_v17, %v110_v17 }
  0xed   :  { %121 = vst.msk [vmem:[%s198_s3 + $0x4] sm:$0xf] %vm119_vm3, %v134_v18 }

// kernel: transformer_forward.41
= control target key start
LH: loop header
LB: loop body
LE: loop exit
PB: predicated region body
PF: predicated region fallthrough
CT: control target
= control target key end

     0   :  { %v136_v0 = vmov 0.0   ;;  %vm137_vm0 = vmmov 0   ;;  %vm46_vm1 = vcmask 261120   ;;  %s176_s1 = inlined_call_operand.vmem [shape: bf16[32,128], index: 1, kind: input, shape index: {}]   ;;  %s177_s0 = inlined_call_operand.vmem [shape: bf16[16,32], index: 0, kind: input, shape index: {}]   ;;  %s178_s2 = inlined_call_operand.vmem [shape: f32[1,128], index: 2, kind: input, shape index: {}]   ;;  %s179_s3 = inlined_call_operand.vmem [shape: f32[16,128], index: 3, kind: output, shape index: {}]  }
   0x1   :  { %123 = vmatprep.subr.bf16.mxu0 %v136_v0  ;;  %v133_v1 = vld [vmem:[%s176_s1] sm:$0xff]   ;;  %127 = vmatprep.mubr.msk.bf16.mxu0 %vm137_vm0, %v136_v0  ;;  %v134_v2 = vld [vmem:[%s176_s1 + $0x8] sm:$0xff]  }
   0x2   :  { %124 = vmatpush3.bf16.msra.mxu0 %v133_v1  ;;  %v135_v3 = vld [vmem:[%s177_s0] sm:$0xff]  }
   0x3   :  { %125 = vmatprep.subr.bf16.mxu0 %v136_v0  ;;  %v119_v4 = vld [vmem:[%s178_s2] ss:$0 sm:$0xff] }
   0x6   :  { %126 = vmatpush3.bf16.msra.mxu0 %v134_v2 }
   0x9   :  { %128 = vmatmul.mubr.msk.bf16.vlgmr.msra.gmra.mrb[0].mxu0 %vm46_vm1, %v135_v3 }
  0xdc   :  { %v84_v5 = vpop.f32.mrb[0].mxu0 }
  0xdd   :  { %v107_v6 = vadd.f32 %v119_v4, %v84_v5  ;;  %v129_v7 = vpop.f32.mrb[1].mxu0 }
  0xde   :  { %v87_v8 = vpop.f32.mrb[2].mxu0 }
  0xdf   :  { %109 = vst [vmem:[%s179_s3] sm:$0xff] %v107_v6  ;;  %v108_v9 = vadd.f32 %v119_v4, %v87_v8  ;;  %v130_v10 = vpop.f32.mrb[3].mxu0 }
  0xe1   :  { %110 = vst [vmem:[%s179_s3 + $0x8] sm:$0xff] %v108_v9 }

</bundles_post_ra>
